<compile_context>
chip_gen: v7x
topology: tpu7x:2x2x1
jax: 0.10.0
libtpu: 0.0.40
codegen_flags: <defaults>
</compile_context>

<pallas_src>
import math

import jax
import jax.numpy as jnp
import numpy as np
from jax.experimental import pallas as pl
from jax.experimental.pallas import tpu as pltpu

# ---- synthetic dual-encoder config (tiny) ------------------------------------
B, S, H = 2, 8, 32          # batch, seq, hidden (same for query & passage sides)
NUM_HEADS = 2
DH = H // NUM_HEADS
FF = 64                     # intermediate size
NUM_LAYERS = 2
VOCAB = 100
SCALE = 1.0 / math.sqrt(DH)
LN_EPS = 1e-12
NEG = -1e9

# stacked weights: leading axis 0 = lm_q, 1 = lm_p
WKEYS = ["wqkv", "bqkv", "wo", "bo", "ln1g", "ln1b",
         "w1", "b1", "w2", "b2", "ln2g", "ln2b"]


def _layernorm(x, g, b, eps=LN_EPS):
    mu = jnp.mean(x, axis=-1, keepdims=True)
    var = jnp.mean((x - mu) ** 2, axis=-1, keepdims=True)
    return (x - mu) * jax.lax.rsqrt(var + eps) * g + b


# ---- fused dual-encoder Pallas kernel ----------------------------------------
def encoder_kernel(x_ref, mask_ref,
                   wqkv_ref, bqkv_ref, wo_ref, bo_ref,
                   ln1g_ref, ln1b_ref,
                   w1_ref, b1_ref, w2_ref, b2_ref,
                   ln2g_ref, ln2b_ref,
                   reps_ref):
    """One grid step = one encoder side (query or passage): all layers + pooling."""
    mask = mask_ref[0]                                   # (B, S) float
    neg = (1.0 - mask)[:, None, :] * NEG                 # (B, 1, S) additive key mask
    x = x_ref[0].reshape(B * S, H)                       # flattened batch slab

    for l in range(NUM_LAYERS):
        # Fused QKV projection: one (B*S, H) @ (H, 3H) matmul.
        qkv = jnp.dot(x, wqkv_ref[0, l],
                      preferred_element_type=jnp.float32) + bqkv_ref[0, l]

        heads = []
        for h in range(NUM_HEADS):
            q_h = qkv[:, h * DH:(h + 1) * DH].reshape(B, S, DH)
            k_h = qkv[:, H + h * DH:H + (h + 1) * DH].reshape(B, S, DH)
            v_h = qkv[:, 2 * H + h * DH:2 * H + (h + 1) * DH].reshape(B, S, DH)
            s = jnp.einsum("bqd,bkd->bqk", q_h, k_h,
                           preferred_element_type=jnp.float32) * SCALE + neg
            s = s - jnp.max(s, axis=-1, keepdims=True)
            p = jnp.exp(s)
            p = p * pl.reciprocal(jnp.sum(p, axis=-1, keepdims=True), approx=True)
            heads.append(jnp.einsum("bqk,bkd->bqd", p, v_h,
                                    preferred_element_type=jnp.float32))

        # Concatenate heads and do a single (B*S, H) @ (H, H) output projection.
        ctx = jnp.concatenate(heads, axis=-1).reshape(B * S, H)
        attn = jnp.dot(ctx, wo_ref[0, l],
                       preferred_element_type=jnp.float32) + bo_ref[0, l]

        h1 = _layernorm(x + attn, ln1g_ref[0, l], ln1b_ref[0, l])
        ff = jnp.dot(
            jax.nn.gelu(jnp.dot(h1, w1_ref[0, l],
                                preferred_element_type=jnp.float32) + b1_ref[0, l]),
            w2_ref[0, l], preferred_element_type=jnp.float32) + b2_ref[0, l]
        x = _layernorm(h1 + ff, ln2g_ref[0, l], ln2b_ref[0, l])

    # Masked mean pooling (matches DualEncoderMeanPooling.mean_pooling).
    xb = x.reshape(B, S, H)
    summed = jnp.sum(xb * mask[:, :, None], axis=1)      # (B, H)
    denom = jnp.sum(mask, axis=1, keepdims=True)         # (B, 1)
    reps_ref[0] = summed / denom


def _side_spec(shape):
    """BlockSpec selecting one encoder side (leading axis) per grid step."""
    nd = len(shape)
    zeros = (0,) * (nd - 1)
    return pl.BlockSpec((1,) + tuple(shape[1:]),
                        lambda e, _z=zeros: (e,) + _z)


# ---- forward wrapper ----------------------------------------------------------
def _embed(params, ids, e):
    x = params["word_emb"][e][ids] + params["pos_emb"][e][None]
    return _layernorm(x, params["emb_ln_g"][e], params["emb_ln_b"][e])


def dual_encoder_forward(params, q_ids, q_mask, p_ids, p_mask):
    # Embedding lookup + embedding layernorm (plain-JAX glue; gather op).
    qx = _embed(params, q_ids, 0)
    px = _embed(params, p_ids, 1)
    # TODO(synk): the fused kernel stacks query/passage sides, so it assumes
    # equal query/passage batch shapes; unequal shapes need padding or two calls.
    x = jnp.stack([qx, px], axis=0)                               # (2, B, S, H)
    mask = jnp.stack([q_mask, p_mask], axis=0).astype(jnp.float32)  # (2, B, S)

    weights = [params[k] for k in WKEYS]
    in_specs = ([_side_spec(x.shape), _side_spec(mask.shape)]
                + [_side_spec(w.shape) for w in weights])

    reps = pl.pallas_call(
        encoder_kernel,
        grid=(2,),                                       # encoder side: query / passage
        in_specs=in_specs,
        out_specs=_side_spec((2, B, H)),
        out_shape=jax.ShapeDtypeStruct((2, B, H), jnp.float32),
        compiler_params=pltpu.CompilerParams(
            dimension_semantics=("parallel",)),          # v7x: split sides over 2 TCs
    )(x, mask, *weights)

    q_reps, p_reps = reps[0], reps[1]
    scores = jnp.dot(q_reps, p_reps.T)                   # compute_similarity
    return scores, q_reps, p_reps


# ---- pure-JAX reference (for verification) ------------------------------------
def reference_encode(params, ids, mask, e):
    x = params["word_emb"][e][ids] + params["pos_emb"][e][None]
    x = _layernorm(x, params["emb_ln_g"][e], params["emb_ln_b"][e])
    maskf = mask.astype(jnp.float32)
    neg = (1.0 - maskf)[:, None, :] * NEG
    for l in range(NUM_LAYERS):
        qkv = x @ params["wqkv"][e, l] + params["bqkv"][e, l]
        heads = []
        for h in range(NUM_HEADS):
            q_h = qkv[..., h * DH:(h + 1) * DH]
            k_h = qkv[..., H + h * DH:H + (h + 1) * DH]
            v_h = qkv[..., 2 * H + h * DH:2 * H + (h + 1) * DH]
            s = jnp.einsum("bqd,bkd->bqk", q_h, k_h) * SCALE + neg
            p = jax.nn.softmax(s, axis=-1)
            heads.append(jnp.einsum("bqk,bkd->bqd", p, v_h))
        ctx = jnp.concatenate(heads, axis=-1)
        attn = ctx @ params["wo"][e, l] + params["bo"][e, l]
        h1 = _layernorm(x + attn, params["ln1g"][e, l], params["ln1b"][e, l])
        ff = (jax.nn.gelu(h1 @ params["w1"][e, l] + params["b1"][e, l])
              @ params["w2"][e, l] + params["b2"][e, l])
        x = _layernorm(h1 + ff, params["ln2g"][e, l], params["ln2b"][e, l])
    reps = (x * maskf[..., None]).sum(axis=1) / maskf.sum(axis=1, keepdims=True)
    return reps


def reference_forward(params, q_ids, q_mask, p_ids, p_mask):
    q_reps = reference_encode(params, q_ids, q_mask, 0)
    p_reps = reference_encode(params, p_ids, p_mask, 1)
    return q_reps @ p_reps.T, q_reps, p_reps


# ---- deterministic parameter init ---------------------------------------------
def init_params(key):
    keys = iter(jax.random.split(key, 64))

    def nrm(shape, scale=0.1):
        return (scale * jax.random.normal(next(keys), shape)).astype(jnp.float32)

    # TODO(synk): pretrained HF checkpoint loading / gradient checkpointing and
    # the training branch (contrastive loss, dist.all_gather) have no Pallas
    # equivalent here; weights are synthetic deterministic inits, eval path only.
    return {
        "word_emb": nrm((2, VOCAB, H)),
        "pos_emb": nrm((2, S, H)),
        "emb_ln_g": jnp.ones((2, 1, H), jnp.float32),
        "emb_ln_b": jnp.zeros((2, 1, H), jnp.float32),
        "wqkv": nrm((2, NUM_LAYERS, H, 3 * H)),
        "bqkv": nrm((2, NUM_LAYERS, 1, 3 * H)),
        "wo":   nrm((2, NUM_LAYERS, H, H)),
        "bo":   nrm((2, NUM_LAYERS, 1, H)),
        "ln1g": jnp.ones((2, NUM_LAYERS, 1, H), jnp.float32),
        "ln1b": jnp.zeros((2, NUM_LAYERS, 1, H), jnp.float32),
        "w1":   nrm((2, NUM_LAYERS, H, FF)),
        "b1":   nrm((2, NUM_LAYERS, 1, FF)),
        "w2":   nrm((2, NUM_LAYERS, FF, H)),
        "b2":   nrm((2, NUM_LAYERS, 1, H)),
        "ln2g": jnp.ones((2, NUM_LAYERS, 1, H), jnp.float32),
        "ln2b": jnp.zeros((2, NUM_LAYERS, 1, H), jnp.float32),
    }


if __name__ == "__main__":
    key = jax.random.PRNGKey(0)
    k_params, k_q, k_p = jax.random.split(key, 3)
    params = init_params(k_params)

    q_ids = jax.random.randint(k_q, (B, S), 0, VOCAB, dtype=jnp.int32)
    p_ids = jax.random.randint(k_p, (B, S), 0, VOCAB, dtype=jnp.int32)
    q_mask = jnp.array([[1] * S, [1] * (S - 1) + [0]], dtype=jnp.float32)
    p_mask = jnp.array([[1] * (S - 3) + [0] * 3, [1] * S], dtype=jnp.float32)

    forward = jax.jit(dual_encoder_forward)
    scores, q_reps, p_reps = forward(params, q_ids, q_mask, p_ids, p_mask)
    jax.block_until_ready((scores, q_reps, p_reps))

    assert scores.shape == (B, B) and scores.dtype == jnp.float32
    ref_scores, ref_q, ref_p = reference_forward(params, q_ids, q_mask, p_ids, p_mask)
    np.testing.assert_allclose(np.asarray(q_reps), np.asarray(ref_q),
                               atol=2e-3, rtol=2e-2)
    np.testing.assert_allclose(np.asarray(p_reps), np.asarray(ref_p),
                               atol=2e-3, rtol=2e-2)
    np.testing.assert_allclose(np.asarray(scores), np.asarray(ref_scores),
                               atol=2e-3, rtol=2e-2)
    print("KERNEL_OK")
</pallas_src>

<mosaic_0001>
module attributes {stable_mosaic.version = 11 : i64} {
  func.func @encoder_kernel(%arg0: i32, %arg1: memref<1x2x8x32xf32, #tpu.memory_space<vmem>>, %arg2: memref<1x2x8xf32, #tpu.memory_space<vmem>>, %arg3: memref<1x2x32x96xf32, #tpu.memory_space<vmem>>, %arg4: memref<1x2x1x96xf32, #tpu.memory_space<vmem>>, %arg5: memref<1x2x32x32xf32, #tpu.memory_space<vmem>>, %arg6: memref<1x2x1x32xf32, #tpu.memory_space<vmem>>, %arg7: memref<1x2x1x32xf32, #tpu.memory_space<vmem>>, %arg8: memref<1x2x1x32xf32, #tpu.memory_space<vmem>>, %arg9: memref<1x2x32x64xf32, #tpu.memory_space<vmem>>, %arg10: memref<1x2x1x64xf32, #tpu.memory_space<vmem>>, %arg11: memref<1x2x64x32xf32, #tpu.memory_space<vmem>>, %arg12: memref<1x2x1x32xf32, #tpu.memory_space<vmem>>, %arg13: memref<1x2x1x32xf32, #tpu.memory_space<vmem>>, %arg14: memref<1x2x1x32xf32, #tpu.memory_space<vmem>>, %arg15: memref<1x2x32xf32, #tpu.memory_space<vmem>>) attributes {dimension_semantics = [#tpu.dimension_semantics<parallel>], iteration_bounds = array<i64: 2>, scalar_prefetch = 0 : i64, scratch_operands = 0 : i64, tpu.core_type = #tpu.core_type<tc>, window_params = [{transform_indices = @transform_0, window_bounds = array<i64: 1, 2, 8, 32>}, {transform_indices = @transform_1, window_bounds = array<i64: 1, 2, 8>}, {transform_indices = @transform_2, window_bounds = array<i64: 1, 2, 32, 96>}, {transform_indices = @transform_3, window_bounds = array<i64: 1, 2, 1, 96>}, {transform_indices = @transform_4, window_bounds = array<i64: 1, 2, 32, 32>}, {transform_indices = @transform_5, window_bounds = array<i64: 1, 2, 1, 32>}, {transform_indices = @transform_6, window_bounds = array<i64: 1, 2, 1, 32>}, {transform_indices = @transform_7, window_bounds = array<i64: 1, 2, 1, 32>}, {transform_indices = @transform_8, window_bounds = array<i64: 1, 2, 32, 64>}, {transform_indices = @transform_9, window_bounds = array<i64: 1, 2, 1, 64>}, {transform_indices = @transform_10, window_bounds = array<i64: 1, 2, 64, 32>}, {transform_indices = @transform_11, window_bounds = array<i64: 1, 2, 1, 32>}, {transform_indices = @transform_12, window_bounds = array<i64: 1, 2, 1, 32>}, {transform_indices = @transform_13, window_bounds = array<i64: 1, 2, 1, 32>}, {transform_indices = @transform_14, window_bounds = array<i64: 1, 2, 32>}]} {
    %c0 = arith.constant 0 : index
    %c0_0 = arith.constant 0 : index
    %c0_1 = arith.constant 0 : index
    %0 = vector.load %arg2[%c0, %c0_0, %c0_1] : memref<1x2x8xf32, #tpu.memory_space<vmem>>, vector<1x2x8xf32>
    %1 = vector.shape_cast %0 : vector<1x2x8xf32> to vector<2x8xf32>
    %cst = arith.constant 1.000000e+00 : f32
    %2 = vector.broadcast %cst : f32 to vector<2x8xf32>
    %3 = arith.subf %2, %1 : vector<2x8xf32>
    %4 = vector.shape_cast %3 : vector<2x8xf32> to vector<2x1x8xf32>
    %cst_2 = arith.constant -1.000000e+09 : f32
    %5 = vector.broadcast %cst_2 : f32 to vector<2x1x8xf32>
    %6 = arith.mulf %4, %5 : vector<2x1x8xf32>
    %c0_3 = arith.constant 0 : index
    %c0_4 = arith.constant 0 : index
    %c0_5 = arith.constant 0 : index
    %c0_6 = arith.constant 0 : index
    %7 = vector.load %arg1[%c0_3, %c0_4, %c0_5, %c0_6] : memref<1x2x8x32xf32, #tpu.memory_space<vmem>>, vector<1x2x8x32xf32>
    %8 = vector.shape_cast %7 : vector<1x2x8x32xf32> to vector<2x8x32xf32>
    %9 = vector.shape_cast %8 : vector<2x8x32xf32> to vector<16x32xf32>
    %c0_7 = arith.constant 0 : index
    %c0_8 = arith.constant 0 : index
    %c0_9 = arith.constant 0 : index
    %c0_10 = arith.constant 0 : index
    %10 = vector.load %arg3[%c0_7, %c0_8, %c0_9, %c0_10] : memref<1x2x32x96xf32, #tpu.memory_space<vmem>>, vector<1x1x32x96xf32>
    %11 = vector.shape_cast %10 : vector<1x1x32x96xf32> to vector<32x96xf32>
    %cst_11 = arith.constant dense<0.000000e+00> : vector<16x96xf32>
    %12 = tpu.matmul %9, %11, %cst_11 {dimension_numbers = #tpu.dot_dimension_numbers<[1], [0], [0], [1], [0, 0, 1, 1], [], []>} : vector<16x32xf32>, vector<32x96xf32>, vector<16x96xf32> -> vector<16x96xf32>
    %c0_12 = arith.constant 0 : index
    %c0_13 = arith.constant 0 : index
    %c0_14 = arith.constant 0 : index
    %c0_15 = arith.constant 0 : index
    %13 = vector.load %arg4[%c0_12, %c0_13, %c0_14, %c0_15] : memref<1x2x1x96xf32, #tpu.memory_space<vmem>>, vector<1x1x1x96xf32>
    %14 = vector.shape_cast %13 : vector<1x1x1x96xf32> to vector<1x96xf32>
    %15 = vector.broadcast %14 : vector<1x96xf32> to vector<16x96xf32>
    %16 = arith.addf %12, %15 : vector<16x96xf32>
    %17 = vector.extract_strided_slice %16 {offsets = [0, 0], sizes = [16, 16], strides = [1, 1]} : vector<16x96xf32> to vector<16x16xf32>
    %18 = vector.shape_cast %17 : vector<16x16xf32> to vector<2x8x16xf32>
    %19 = vector.extract_strided_slice %16 {offsets = [0, 32], sizes = [16, 16], strides = [1, 1]} : vector<16x96xf32> to vector<16x16xf32>
    %20 = vector.shape_cast %19 : vector<16x16xf32> to vector<2x8x16xf32>
    %21 = vector.extract_strided_slice %16 {offsets = [0, 64], sizes = [16, 16], strides = [1, 1]} : vector<16x96xf32> to vector<16x16xf32>
    %22 = vector.shape_cast %21 : vector<16x16xf32> to vector<2x8x16xf32>
    "tpu.trace_start"() <{level = 10 : i32, message = "bqd,bkd->bqk"}> : () -> ()
    %cst_16 = arith.constant dense<0.000000e+00> : vector<2x8x8xf32>
    %23 = tpu.matmul %18, %20, %cst_16 {dimension_numbers = #tpu.dot_dimension_numbers<[2], [2], [1], [1], [0, 0, 0, 1, 1, 1], [0], [0]>} : vector<2x8x16xf32>, vector<2x8x16xf32>, vector<2x8x8xf32> -> vector<2x8x8xf32>
    "tpu.trace_stop"() : () -> ()
    %cst_17 = arith.constant 2.500000e-01 : f32
    %24 = vector.broadcast %cst_17 : f32 to vector<2x8x8xf32>
    %25 = arith.mulf %23, %24 : vector<2x8x8xf32>
    %26 = vector.broadcast %6 : vector<2x1x8xf32> to vector<2x8x8xf32>
    %27 = arith.addf %25, %26 : vector<2x8x8xf32>
    %cst_18 = arith.constant dense<0xFF800000> : vector<2x8xf32>
    %28 = vector.multi_reduction <maximumf>, %27, %cst_18 [2] : vector<2x8x8xf32> to vector<2x8xf32>
    %29 = vector.shape_cast %28 : vector<2x8xf32> to vector<2x8x1xf32>
    %30 = vector.broadcast %29 : vector<2x8x1xf32> to vector<2x8x8xf32>
    %31 = arith.subf %27, %30 : vector<2x8x8xf32>
    %32 = math.exp %31 : vector<2x8x8xf32>
    %cst_19 = arith.constant dense<0.000000e+00> : vector<2x8xf32>
    %33 = vector.multi_reduction <add>, %32, %cst_19 [2] : vector<2x8x8xf32> to vector<2x8xf32>
    %34 = vector.shape_cast %33 : vector<2x8xf32> to vector<2x8x1xf32>
    %35 = tpu.reciprocal %34 {approx = true} : vector<2x8x1xf32> -> vector<2x8x1xf32>
    %36 = vector.broadcast %35 : vector<2x8x1xf32> to vector<2x8x8xf32>
    %37 = arith.mulf %32, %36 : vector<2x8x8xf32>
    "tpu.trace_start"() <{level = 10 : i32, message = "bqk,bkd->bqd"}> : () -> ()
    %cst_20 = arith.constant dense<0.000000e+00> : vector<2x8x16xf32>
    %38 = tpu.matmul %37, %22, %cst_20 {dimension_numbers = #tpu.dot_dimension_numbers<[2], [1], [1], [2], [0, 0, 0, 1, 1, 2], [0], [0]>} : vector<2x8x8xf32>, vector<2x8x16xf32>, vector<2x8x16xf32> -> vector<2x8x16xf32>
    "tpu.trace_stop"() : () -> ()
    %39 = vector.extract_strided_slice %16 {offsets = [0, 16], sizes = [16, 16], strides = [1, 1]} : vector<16x96xf32> to vector<16x16xf32>
    %40 = vector.shape_cast %39 : vector<16x16xf32> to vector<2x8x16xf32>
    %41 = vector.extract_strided_slice %16 {offsets = [0, 48], sizes = [16, 16], strides = [1, 1]} : vector<16x96xf32> to vector<16x16xf32>
    %42 = vector.shape_cast %41 : vector<16x16xf32> to vector<2x8x16xf32>
    %43 = vector.extract_strided_slice %16 {offsets = [0, 80], sizes = [16, 16], strides = [1, 1]} : vector<16x96xf32> to vector<16x16xf32>
    %44 = vector.shape_cast %43 : vector<16x16xf32> to vector<2x8x16xf32>
    "tpu.trace_start"() <{level = 10 : i32, message = "bqd,bkd->bqk"}> : () -> ()
    %cst_21 = arith.constant dense<0.000000e+00> : vector<2x8x8xf32>
    %45 = tpu.matmul %40, %42, %cst_21 {dimension_numbers = #tpu.dot_dimension_numbers<[2], [2], [1], [1], [0, 0, 0, 1, 1, 1], [0], [0]>} : vector<2x8x16xf32>, vector<2x8x16xf32>, vector<2x8x8xf32> -> vector<2x8x8xf32>
    "tpu.trace_stop"() : () -> ()
    %cst_22 = arith.constant 2.500000e-01 : f32
    %46 = vector.broadcast %cst_22 : f32 to vector<2x8x8xf32>
    %47 = arith.mulf %45, %46 : vector<2x8x8xf32>
    %48 = vector.broadcast %6 : vector<2x1x8xf32> to vector<2x8x8xf32>
    %49 = arith.addf %47, %48 : vector<2x8x8xf32>
    %cst_23 = arith.constant dense<0xFF800000> : vector<2x8xf32>
    %50 = vector.multi_reduction <maximumf>, %49, %cst_23 [2] : vector<2x8x8xf32> to vector<2x8xf32>
    %51 = vector.shape_cast %50 : vector<2x8xf32> to vector<2x8x1xf32>
    %52 = vector.broadcast %51 : vector<2x8x1xf32> to vector<2x8x8xf32>
    %53 = arith.subf %49, %52 : vector<2x8x8xf32>
    %54 = math.exp %53 : vector<2x8x8xf32>
    %cst_24 = arith.constant dense<0.000000e+00> : vector<2x8xf32>
    %55 = vector.multi_reduction <add>, %54, %cst_24 [2] : vector<2x8x8xf32> to vector<2x8xf32>
    %56 = vector.shape_cast %55 : vector<2x8xf32> to vector<2x8x1xf32>
    %57 = tpu.reciprocal %56 {approx = true} : vector<2x8x1xf32> -> vector<2x8x1xf32>
    %58 = vector.broadcast %57 : vector<2x8x1xf32> to vector<2x8x8xf32>
    %59 = arith.mulf %54, %58 : vector<2x8x8xf32>
    "tpu.trace_start"() <{level = 10 : i32, message = "bqk,bkd->bqd"}> : () -> ()
    %cst_25 = arith.constant dense<0.000000e+00> : vector<2x8x16xf32>
    %60 = tpu.matmul %59, %44, %cst_25 {dimension_numbers = #tpu.dot_dimension_numbers<[2], [1], [1], [2], [0, 0, 0, 1, 1, 2], [0], [0]>} : vector<2x8x8xf32>, vector<2x8x16xf32>, vector<2x8x16xf32> -> vector<2x8x16xf32>
    "tpu.trace_stop"() : () -> ()
    %61 = tpu.concatenate %38, %60 in 2 : vector<2x8x16xf32>, vector<2x8x16xf32> -> vector<2x8x32xf32>
    %62 = vector.shape_cast %61 : vector<2x8x32xf32> to vector<16x32xf32>
    %c0_26 = arith.constant 0 : index
    %c0_27 = arith.constant 0 : index
    %c0_28 = arith.constant 0 : index
    %c0_29 = arith.constant 0 : index
    %63 = vector.load %arg5[%c0_26, %c0_27, %c0_28, %c0_29] : memref<1x2x32x32xf32, #tpu.memory_space<vmem>>, vector<1x1x32x32xf32>
    %64 = vector.shape_cast %63 : vector<1x1x32x32xf32> to vector<32x32xf32>
    %cst_30 = arith.constant dense<0.000000e+00> : vector<16x32xf32>
    %65 = tpu.matmul %62, %64, %cst_30 {dimension_numbers = #tpu.dot_dimension_numbers<[1], [0], [0], [1], [0, 0, 1, 1], [], []>} : vector<16x32xf32>, vector<32x32xf32>, vector<16x32xf32> -> vector<16x32xf32>
    %c0_31 = arith.constant 0 : index
    %c0_32 = arith.constant 0 : index
    %c0_33 = arith.constant 0 : index
    %c0_34 = arith.constant 0 : index
    %66 = vector.load %arg6[%c0_31, %c0_32, %c0_33, %c0_34] : memref<1x2x1x32xf32, #tpu.memory_space<vmem>>, vector<1x1x1x32xf32>
    %67 = vector.shape_cast %66 : vector<1x1x1x32xf32> to vector<1x32xf32>
    %68 = vector.broadcast %67 : vector<1x32xf32> to vector<16x32xf32>
    %69 = arith.addf %65, %68 : vector<16x32xf32>
    %70 = arith.addf %9, %69 : vector<16x32xf32>
    %c0_35 = arith.constant 0 : index
    %c0_36 = arith.constant 0 : index
    %c0_37 = arith.constant 0 : index
    %c0_38 = arith.constant 0 : index
    %71 = vector.load %arg7[%c0_35, %c0_36, %c0_37, %c0_38] : memref<1x2x1x32xf32, #tpu.memory_space<vmem>>, vector<1x1x1x32xf32>
    %72 = vector.shape_cast %71 : vector<1x1x1x32xf32> to vector<1x32xf32>
    %c0_39 = arith.constant 0 : index
    %c0_40 = arith.constant 0 : index
    %c0_41 = arith.constant 0 : index
    %c0_42 = arith.constant 0 : index
    %73 = vector.load %arg8[%c0_39, %c0_40, %c0_41, %c0_42] : memref<1x2x1x32xf32, #tpu.memory_space<vmem>>, vector<1x1x1x32xf32>
    %74 = vector.shape_cast %73 : vector<1x1x1x32xf32> to vector<1x32xf32>
    %cst_43 = arith.constant dense<0.000000e+00> : vector<16xf32>
    %75 = vector.multi_reduction <add>, %70, %cst_43 [1] : vector<16x32xf32> to vector<16xf32>
    %76 = vector.shape_cast %75 : vector<16xf32> to vector<16x1xf32>
    %cst_44 = arith.constant 3.200000e+01 : f32
    %77 = vector.broadcast %cst_44 : f32 to vector<16x1xf32>
    %78 = arith.divf %76, %77 : vector<16x1xf32>
    %79 = vector.broadcast %78 : vector<16x1xf32> to vector<16x32xf32>
    %80 = arith.subf %70, %79 : vector<16x32xf32>
    %81 = arith.mulf %80, %80 : vector<16x32xf32>
    %cst_45 = arith.constant dense<0.000000e+00> : vector<16xf32>
    %82 = vector.multi_reduction <add>, %81, %cst_45 [1] : vector<16x32xf32> to vector<16xf32>
    %83 = vector.shape_cast %82 : vector<16xf32> to vector<16x1xf32>
    %cst_46 = arith.constant 3.200000e+01 : f32
    %84 = vector.broadcast %cst_46 : f32 to vector<16x1xf32>
    %85 = arith.divf %83, %84 : vector<16x1xf32>
    %86 = vector.broadcast %78 : vector<16x1xf32> to vector<16x32xf32>
    %87 = arith.subf %70, %86 : vector<16x32xf32>
    %cst_47 = arith.constant 9.99999996E-13 : f32
    %88 = vector.broadcast %cst_47 : f32 to vector<16x1xf32>
    %89 = arith.addf %85, %88 : vector<16x1xf32>
    %90 = math.rsqrt %89 : vector<16x1xf32>
    %91 = vector.broadcast %90 : vector<16x1xf32> to vector<16x32xf32>
    %92 = arith.mulf %87, %91 : vector<16x32xf32>
    %93 = vector.broadcast %72 : vector<1x32xf32> to vector<16x32xf32>
    %94 = arith.mulf %92, %93 : vector<16x32xf32>
    %95 = vector.broadcast %74 : vector<1x32xf32> to vector<16x32xf32>
    %96 = arith.addf %94, %95 : vector<16x32xf32>
    %c0_48 = arith.constant 0 : index
    %c0_49 = arith.constant 0 : index
    %c0_50 = arith.constant 0 : index
    %c0_51 = arith.constant 0 : index
    %97 = vector.load %arg9[%c0_48, %c0_49, %c0_50, %c0_51] : memref<1x2x32x64xf32, #tpu.memory_space<vmem>>, vector<1x1x32x64xf32>
    %98 = vector.shape_cast %97 : vector<1x1x32x64xf32> to vector<32x64xf32>
    %cst_52 = arith.constant dense<0.000000e+00> : vector<16x64xf32>
    %99 = tpu.matmul %96, %98, %cst_52 {dimension_numbers = #tpu.dot_dimension_numbers<[1], [0], [0], [1], [0, 0, 1, 1], [], []>} : vector<16x32xf32>, vector<32x64xf32>, vector<16x64xf32> -> vector<16x64xf32>
    %c0_53 = arith.constant 0 : index
    %c0_54 = arith.constant 0 : index
    %c0_55 = arith.constant 0 : index
    %c0_56 = arith.constant 0 : index
    %100 = vector.load %arg10[%c0_53, %c0_54, %c0_55, %c0_56] : memref<1x2x1x64xf32, #tpu.memory_space<vmem>>, vector<1x1x1x64xf32>
    %101 = vector.shape_cast %100 : vector<1x1x1x64xf32> to vector<1x64xf32>
    %102 = vector.broadcast %101 : vector<1x64xf32> to vector<16x64xf32>
    %103 = arith.addf %99, %102 : vector<16x64xf32>
    %104 = arith.mulf %103, %103 : vector<16x64xf32>
    %105 = arith.mulf %103, %104 : vector<16x64xf32>
    %cst_57 = arith.constant 4.471500e-02 : f32
    %106 = vector.broadcast %cst_57 : f32 to vector<16x64xf32>
    %107 = arith.mulf %106, %105 : vector<16x64xf32>
    %108 = arith.addf %103, %107 : vector<16x64xf32>
    %cst_58 = arith.constant 0.797884583 : f32
    %109 = vector.broadcast %cst_58 : f32 to vector<16x64xf32>
    %110 = arith.mulf %109, %108 : vector<16x64xf32>
    %111 = math.tanh %110 : vector<16x64xf32>
    %cst_59 = arith.constant 1.000000e+00 : f32
    %112 = vector.broadcast %cst_59 : f32 to vector<16x64xf32>
    %113 = arith.addf %112, %111 : vector<16x64xf32>
    %cst_60 = arith.constant 5.000000e-01 : f32
    %114 = vector.broadcast %cst_60 : f32 to vector<16x64xf32>
    %115 = arith.mulf %114, %113 : vector<16x64xf32>
    %116 = arith.mulf %103, %115 : vector<16x64xf32>
    %c0_61 = arith.constant 0 : index
    %c0_62 = arith.constant 0 : index
    %c0_63 = arith.constant 0 : index
    %c0_64 = arith.constant 0 : index
    %117 = vector.load %arg11[%c0_61, %c0_62, %c0_63, %c0_64] : memref<1x2x64x32xf32, #tpu.memory_space<vmem>>, vector<1x1x64x32xf32>
    %118 = vector.shape_cast %117 : vector<1x1x64x32xf32> to vector<64x32xf32>
    %cst_65 = arith.constant dense<0.000000e+00> : vector<16x32xf32>
    %119 = tpu.matmul %116, %118, %cst_65 {dimension_numbers = #tpu.dot_dimension_numbers<[1], [0], [0], [1], [0, 0, 1, 1], [], []>} : vector<16x64xf32>, vector<64x32xf32>, vector<16x32xf32> -> vector<16x32xf32>
    %c0_66 = arith.constant 0 : index
    %c0_67 = arith.constant 0 : index
    %c0_68 = arith.constant 0 : index
    %c0_69 = arith.constant 0 : index
    %120 = vector.load %arg12[%c0_66, %c0_67, %c0_68, %c0_69] : memref<1x2x1x32xf32, #tpu.memory_space<vmem>>, vector<1x1x1x32xf32>
    %121 = vector.shape_cast %120 : vector<1x1x1x32xf32> to vector<1x32xf32>
    %122 = vector.broadcast %121 : vector<1x32xf32> to vector<16x32xf32>
    %123 = arith.addf %119, %122 : vector<16x32xf32>
    %124 = arith.addf %96, %123 : vector<16x32xf32>
    %c0_70 = arith.constant 0 : index
    %c0_71 = arith.constant 0 : index
    %c0_72 = arith.constant 0 : index
    %c0_73 = arith.constant 0 : index
    %125 = vector.load %arg13[%c0_70, %c0_71, %c0_72, %c0_73] : memref<1x2x1x32xf32, #tpu.memory_space<vmem>>, vector<1x1x1x32xf32>
    %126 = vector.shape_cast %125 : vector<1x1x1x32xf32> to vector<1x32xf32>
    %c0_74 = arith.constant 0 : index
    %c0_75 = arith.constant 0 : index
    %c0_76 = arith.constant 0 : index
    %c0_77 = arith.constant 0 : index
    %127 = vector.load %arg14[%c0_74, %c0_75, %c0_76, %c0_77] : memref<1x2x1x32xf32, #tpu.memory_space<vmem>>, vector<1x1x1x32xf32>
    %128 = vector.shape_cast %127 : vector<1x1x1x32xf32> to vector<1x32xf32>
    %cst_78 = arith.constant dense<0.000000e+00> : vector<16xf32>
    %129 = vector.multi_reduction <add>, %124, %cst_78 [1] : vector<16x32xf32> to vector<16xf32>
    %130 = vector.shape_cast %129 : vector<16xf32> to vector<16x1xf32>
    %cst_79 = arith.constant 3.200000e+01 : f32
    %131 = vector.broadcast %cst_79 : f32 to vector<16x1xf32>
    %132 = arith.divf %130, %131 : vector<16x1xf32>
    %133 = vector.broadcast %132 : vector<16x1xf32> to vector<16x32xf32>
    %134 = arith.subf %124, %133 : vector<16x32xf32>
    %135 = arith.mulf %134, %134 : vector<16x32xf32>
    %cst_80 = arith.constant dense<0.000000e+00> : vector<16xf32>
    %136 = vector.multi_reduction <add>, %135, %cst_80 [1] : vector<16x32xf32> to vector<16xf32>
    %137 = vector.shape_cast %136 : vector<16xf32> to vector<16x1xf32>
    %cst_81 = arith.constant 3.200000e+01 : f32
    %138 = vector.broadcast %cst_81 : f32 to vector<16x1xf32>
    %139 = arith.divf %137, %138 : vector<16x1xf32>
    %140 = vector.broadcast %132 : vector<16x1xf32> to vector<16x32xf32>
    %141 = arith.subf %124, %140 : vector<16x32xf32>
    %cst_82 = arith.constant 9.99999996E-13 : f32
    %142 = vector.broadcast %cst_82 : f32 to vector<16x1xf32>
    %143 = arith.addf %139, %142 : vector<16x1xf32>
    %144 = math.rsqrt %143 : vector<16x1xf32>
    %145 = vector.broadcast %144 : vector<16x1xf32> to vector<16x32xf32>
    %146 = arith.mulf %141, %145 : vector<16x32xf32>
    %147 = vector.broadcast %126 : vector<1x32xf32> to vector<16x32xf32>
    %148 = arith.mulf %146, %147 : vector<16x32xf32>
    %149 = vector.broadcast %128 : vector<1x32xf32> to vector<16x32xf32>
    %150 = arith.addf %148, %149 : vector<16x32xf32>
    %c0_83 = arith.constant 0 : index
    %c1 = arith.constant 1 : index
    %c0_84 = arith.constant 0 : index
    %c0_85 = arith.constant 0 : index
    %151 = vector.load %arg3[%c0_83, %c1, %c0_84, %c0_85] : memref<1x2x32x96xf32, #tpu.memory_space<vmem>>, vector<1x1x32x96xf32>
    %152 = vector.shape_cast %151 : vector<1x1x32x96xf32> to vector<32x96xf32>
    %cst_86 = arith.constant dense<0.000000e+00> : vector<16x96xf32>
    %153 = tpu.matmul %150, %152, %cst_86 {dimension_numbers = #tpu.dot_dimension_numbers<[1], [0], [0], [1], [0, 0, 1, 1], [], []>} : vector<16x32xf32>, vector<32x96xf32>, vector<16x96xf32> -> vector<16x96xf32>
    %c0_87 = arith.constant 0 : index
    %c1_88 = arith.constant 1 : index
    %c0_89 = arith.constant 0 : index
    %c0_90 = arith.constant 0 : index
    %154 = vector.load %arg4[%c0_87, %c1_88, %c0_89, %c0_90] : memref<1x2x1x96xf32, #tpu.memory_space<vmem>>, vector<1x1x1x96xf32>
    %155 = vector.shape_cast %154 : vector<1x1x1x96xf32> to vector<1x96xf32>
    %156 = vector.broadcast %155 : vector<1x96xf32> to vector<16x96xf32>
    %157 = arith.addf %153, %156 : vector<16x96xf32>
    %158 = vector.extract_strided_slice %157 {offsets = [0, 0], sizes = [16, 16], strides = [1, 1]} : vector<16x96xf32> to vector<16x16xf32>
    %159 = vector.shape_cast %158 : vector<16x16xf32> to vector<2x8x16xf32>
    %160 = vector.extract_strided_slice %157 {offsets = [0, 32], sizes = [16, 16], strides = [1, 1]} : vector<16x96xf32> to vector<16x16xf32>
    %161 = vector.shape_cast %160 : vector<16x16xf32> to vector<2x8x16xf32>
    %162 = vector.extract_strided_slice %157 {offsets = [0, 64], sizes = [16, 16], strides = [1, 1]} : vector<16x96xf32> to vector<16x16xf32>
    %163 = vector.shape_cast %162 : vector<16x16xf32> to vector<2x8x16xf32>
    "tpu.trace_start"() <{level = 10 : i32, message = "bqd,bkd->bqk"}> : () -> ()
    %cst_91 = arith.constant dense<0.000000e+00> : vector<2x8x8xf32>
    %164 = tpu.matmul %159, %161, %cst_91 {dimension_numbers = #tpu.dot_dimension_numbers<[2], [2], [1], [1], [0, 0, 0, 1, 1, 1], [0], [0]>} : vector<2x8x16xf32>, vector<2x8x16xf32>, vector<2x8x8xf32> -> vector<2x8x8xf32>
    "tpu.trace_stop"() : () -> ()
    %cst_92 = arith.constant 2.500000e-01 : f32
    %165 = vector.broadcast %cst_92 : f32 to vector<2x8x8xf32>
    %166 = arith.mulf %164, %165 : vector<2x8x8xf32>
    %167 = vector.broadcast %6 : vector<2x1x8xf32> to vector<2x8x8xf32>
    %168 = arith.addf %166, %167 : vector<2x8x8xf32>
    %cst_93 = arith.constant dense<0xFF800000> : vector<2x8xf32>
    %169 = vector.multi_reduction <maximumf>, %168, %cst_93 [2] : vector<2x8x8xf32> to vector<2x8xf32>
    %170 = vector.shape_cast %169 : vector<2x8xf32> to vector<2x8x1xf32>
    %171 = vector.broadcast %170 : vector<2x8x1xf32> to vector<2x8x8xf32>
    %172 = arith.subf %168, %171 : vector<2x8x8xf32>
    %173 = math.exp %172 : vector<2x8x8xf32>
    %cst_94 = arith.constant dense<0.000000e+00> : vector<2x8xf32>
    %174 = vector.multi_reduction <add>, %173, %cst_94 [2] : vector<2x8x8xf32> to vector<2x8xf32>
    %175 = vector.shape_cast %174 : vector<2x8xf32> to vector<2x8x1xf32>
    %176 = tpu.reciprocal %175 {approx = true} : vector<2x8x1xf32> -> vector<2x8x1xf32>
    %177 = vector.broadcast %176 : vector<2x8x1xf32> to vector<2x8x8xf32>
    %178 = arith.mulf %173, %177 : vector<2x8x8xf32>
    "tpu.trace_start"() <{level = 10 : i32, message = "bqk,bkd->bqd"}> : () -> ()
    %cst_95 = arith.constant dense<0.000000e+00> : vector<2x8x16xf32>
    %179 = tpu.matmul %178, %163, %cst_95 {dimension_numbers = #tpu.dot_dimension_numbers<[2], [1], [1], [2], [0, 0, 0, 1, 1, 2], [0], [0]>} : vector<2x8x8xf32>, vector<2x8x16xf32>, vector<2x8x16xf32> -> vector<2x8x16xf32>
    "tpu.trace_stop"() : () -> ()
    %180 = vector.extract_strided_slice %157 {offsets = [0, 16], sizes = [16, 16], strides = [1, 1]} : vector<16x96xf32> to vector<16x16xf32>
    %181 = vector.shape_cast %180 : vector<16x16xf32> to vector<2x8x16xf32>
    %182 = vector.extract_strided_slice %157 {offsets = [0, 48], sizes = [16, 16], strides = [1, 1]} : vector<16x96xf32> to vector<16x16xf32>
    %183 = vector.shape_cast %182 : vector<16x16xf32> to vector<2x8x16xf32>
    %184 = vector.extract_strided_slice %157 {offsets = [0, 80], sizes = [16, 16], strides = [1, 1]} : vector<16x96xf32> to vector<16x16xf32>
    %185 = vector.shape_cast %184 : vector<16x16xf32> to vector<2x8x16xf32>
    "tpu.trace_start"() <{level = 10 : i32, message = "bqd,bkd->bqk"}> : () -> ()
    %cst_96 = arith.constant dense<0.000000e+00> : vector<2x8x8xf32>
    %186 = tpu.matmul %181, %183, %cst_96 {dimension_numbers = #tpu.dot_dimension_numbers<[2], [2], [1], [1], [0, 0, 0, 1, 1, 1], [0], [0]>} : vector<2x8x16xf32>, vector<2x8x16xf32>, vector<2x8x8xf32> -> vector<2x8x8xf32>
    "tpu.trace_stop"() : () -> ()
    %cst_97 = arith.constant 2.500000e-01 : f32
    %187 = vector.broadcast %cst_97 : f32 to vector<2x8x8xf32>
    %188 = arith.mulf %186, %187 : vector<2x8x8xf32>
    %189 = vector.broadcast %6 : vector<2x1x8xf32> to vector<2x8x8xf32>
    %190 = arith.addf %188, %189 : vector<2x8x8xf32>
    %cst_98 = arith.constant dense<0xFF800000> : vector<2x8xf32>
    %191 = vector.multi_reduction <maximumf>, %190, %cst_98 [2] : vector<2x8x8xf32> to vector<2x8xf32>
    %192 = vector.shape_cast %191 : vector<2x8xf32> to vector<2x8x1xf32>
    %193 = vector.broadcast %192 : vector<2x8x1xf32> to vector<2x8x8xf32>
    %194 = arith.subf %190, %193 : vector<2x8x8xf32>
    %195 = math.exp %194 : vector<2x8x8xf32>
    %cst_99 = arith.constant dense<0.000000e+00> : vector<2x8xf32>
    %196 = vector.multi_reduction <add>, %195, %cst_99 [2] : vector<2x8x8xf32> to vector<2x8xf32>
    %197 = vector.shape_cast %196 : vector<2x8xf32> to vector<2x8x1xf32>
    %198 = tpu.reciprocal %197 {approx = true} : vector<2x8x1xf32> -> vector<2x8x1xf32>
    %199 = vector.broadcast %198 : vector<2x8x1xf32> to vector<2x8x8xf32>
    %200 = arith.mulf %195, %199 : vector<2x8x8xf32>
    "tpu.trace_start"() <{level = 10 : i32, message = "bqk,bkd->bqd"}> : () -> ()
    %cst_100 = arith.constant dense<0.000000e+00> : vector<2x8x16xf32>
    %201 = tpu.matmul %200, %185, %cst_100 {dimension_numbers = #tpu.dot_dimension_numbers<[2], [1], [1], [2], [0, 0, 0, 1, 1, 2], [0], [0]>} : vector<2x8x8xf32>, vector<2x8x16xf32>, vector<2x8x16xf32> -> vector<2x8x16xf32>
    "tpu.trace_stop"() : () -> ()
    %202 = tpu.concatenate %179, %201 in 2 : vector<2x8x16xf32>, vector<2x8x16xf32> -> vector<2x8x32xf32>
    %203 = vector.shape_cast %202 : vector<2x8x32xf32> to vector<16x32xf32>
    %c0_101 = arith.constant 0 : index
    %c1_102 = arith.constant 1 : index
    %c0_103 = arith.constant 0 : index
    %c0_104 = arith.constant 0 : index
    %204 = vector.load %arg5[%c0_101, %c1_102, %c0_103, %c0_104] : memref<1x2x32x32xf32, #tpu.memory_space<vmem>>, vector<1x1x32x32xf32>
    %205 = vector.shape_cast %204 : vector<1x1x32x32xf32> to vector<32x32xf32>
    %cst_105 = arith.constant dense<0.000000e+00> : vector<16x32xf32>
    %206 = tpu.matmul %203, %205, %cst_105 {dimension_numbers = #tpu.dot_dimension_numbers<[1], [0], [0], [1], [0, 0, 1, 1], [], []>} : vector<16x32xf32>, vector<32x32xf32>, vector<16x32xf32> -> vector<16x32xf32>
    %c0_106 = arith.constant 0 : index
    %c1_107 = arith.constant 1 : index
    %c0_108 = arith.constant 0 : index
    %c0_109 = arith.constant 0 : index
    %207 = vector.load %arg6[%c0_106, %c1_107, %c0_108, %c0_109] : memref<1x2x1x32xf32, #tpu.memory_space<vmem>>, vector<1x1x1x32xf32>
    %208 = vector.shape_cast %207 : vector<1x1x1x32xf32> to vector<1x32xf32>
    %209 = vector.broadcast %208 : vector<1x32xf32> to vector<16x32xf32>
    %210 = arith.addf %206, %209 : vector<16x32xf32>
    %211 = arith.addf %150, %210 : vector<16x32xf32>
    %c0_110 = arith.constant 0 : index
    %c1_111 = arith.constant 1 : index
    %c0_112 = arith.constant 0 : index
    %c0_113 = arith.constant 0 : index
    %212 = vector.load %arg7[%c0_110, %c1_111, %c0_112, %c0_113] : memref<1x2x1x32xf32, #tpu.memory_space<vmem>>, vector<1x1x1x32xf32>
    %213 = vector.shape_cast %212 : vector<1x1x1x32xf32> to vector<1x32xf32>
    %c0_114 = arith.constant 0 : index
    %c1_115 = arith.constant 1 : index
    %c0_116 = arith.constant 0 : index
    %c0_117 = arith.constant 0 : index
    %214 = vector.load %arg8[%c0_114, %c1_115, %c0_116, %c0_117] : memref<1x2x1x32xf32, #tpu.memory_space<vmem>>, vector<1x1x1x32xf32>
    %215 = vector.shape_cast %214 : vector<1x1x1x32xf32> to vector<1x32xf32>
    %cst_118 = arith.constant dense<0.000000e+00> : vector<16xf32>
    %216 = vector.multi_reduction <add>, %211, %cst_118 [1] : vector<16x32xf32> to vector<16xf32>
    %217 = vector.shape_cast %216 : vector<16xf32> to vector<16x1xf32>
    %cst_119 = arith.constant 3.200000e+01 : f32
    %218 = vector.broadcast %cst_119 : f32 to vector<16x1xf32>
    %219 = arith.divf %217, %218 : vector<16x1xf32>
    %220 = vector.broadcast %219 : vector<16x1xf32> to vector<16x32xf32>
    %221 = arith.subf %211, %220 : vector<16x32xf32>
    %222 = arith.mulf %221, %221 : vector<16x32xf32>
    %cst_120 = arith.constant dense<0.000000e+00> : vector<16xf32>
    %223 = vector.multi_reduction <add>, %222, %cst_120 [1] : vector<16x32xf32> to vector<16xf32>
    %224 = vector.shape_cast %223 : vector<16xf32> to vector<16x1xf32>
    %cst_121 = arith.constant 3.200000e+01 : f32
    %225 = vector.broadcast %cst_121 : f32 to vector<16x1xf32>
    %226 = arith.divf %224, %225 : vector<16x1xf32>
    %227 = vector.broadcast %219 : vector<16x1xf32> to vector<16x32xf32>
    %228 = arith.subf %211, %227 : vector<16x32xf32>
    %cst_122 = arith.constant 9.99999996E-13 : f32
    %229 = vector.broadcast %cst_122 : f32 to vector<16x1xf32>
    %230 = arith.addf %226, %229 : vector<16x1xf32>
    %231 = math.rsqrt %230 : vector<16x1xf32>
    %232 = vector.broadcast %231 : vector<16x1xf32> to vector<16x32xf32>
    %233 = arith.mulf %228, %232 : vector<16x32xf32>
    %234 = vector.broadcast %213 : vector<1x32xf32> to vector<16x32xf32>
    %235 = arith.mulf %233, %234 : vector<16x32xf32>
    %236 = vector.broadcast %215 : vector<1x32xf32> to vector<16x32xf32>
    %237 = arith.addf %235, %236 : vector<16x32xf32>
    %c0_123 = arith.constant 0 : index
    %c1_124 = arith.constant 1 : index
    %c0_125 = arith.constant 0 : index
    %c0_126 = arith.constant 0 : index
    %238 = vector.load %arg9[%c0_123, %c1_124, %c0_125, %c0_126] : memref<1x2x32x64xf32, #tpu.memory_space<vmem>>, vector<1x1x32x64xf32>
    %239 = vector.shape_cast %238 : vector<1x1x32x64xf32> to vector<32x64xf32>
    %cst_127 = arith.constant dense<0.000000e+00> : vector<16x64xf32>
    %240 = tpu.matmul %237, %239, %cst_127 {dimension_numbers = #tpu.dot_dimension_numbers<[1], [0], [0], [1], [0, 0, 1, 1], [], []>} : vector<16x32xf32>, vector<32x64xf32>, vector<16x64xf32> -> vector<16x64xf32>
    %c0_128 = arith.constant 0 : index
    %c1_129 = arith.constant 1 : index
    %c0_130 = arith.constant 0 : index
    %c0_131 = arith.constant 0 : index
    %241 = vector.load %arg10[%c0_128, %c1_129, %c0_130, %c0_131] : memref<1x2x1x64xf32, #tpu.memory_space<vmem>>, vector<1x1x1x64xf32>
    %242 = vector.shape_cast %241 : vector<1x1x1x64xf32> to vector<1x64xf32>
    %243 = vector.broadcast %242 : vector<1x64xf32> to vector<16x64xf32>
    %244 = arith.addf %240, %243 : vector<16x64xf32>
    %245 = arith.mulf %244, %244 : vector<16x64xf32>
    %246 = arith.mulf %244, %245 : vector<16x64xf32>
    %cst_132 = arith.constant 4.471500e-02 : f32
    %247 = vector.broadcast %cst_132 : f32 to vector<16x64xf32>
    %248 = arith.mulf %247, %246 : vector<16x64xf32>
    %249 = arith.addf %244, %248 : vector<16x64xf32>
    %cst_133 = arith.constant 0.797884583 : f32
    %250 = vector.broadcast %cst_133 : f32 to vector<16x64xf32>
    %251 = arith.mulf %250, %249 : vector<16x64xf32>
    %252 = math.tanh %251 : vector<16x64xf32>
    %cst_134 = arith.constant 1.000000e+00 : f32
    %253 = vector.broadcast %cst_134 : f32 to vector<16x64xf32>
    %254 = arith.addf %253, %252 : vector<16x64xf32>
    %cst_135 = arith.constant 5.000000e-01 : f32
    %255 = vector.broadcast %cst_135 : f32 to vector<16x64xf32>
    %256 = arith.mulf %255, %254 : vector<16x64xf32>
    %257 = arith.mulf %244, %256 : vector<16x64xf32>
    %c0_136 = arith.constant 0 : index
    %c1_137 = arith.constant 1 : index
    %c0_138 = arith.constant 0 : index
    %c0_139 = arith.constant 0 : index
    %258 = vector.load %arg11[%c0_136, %c1_137, %c0_138, %c0_139] : memref<1x2x64x32xf32, #tpu.memory_space<vmem>>, vector<1x1x64x32xf32>
    %259 = vector.shape_cast %258 : vector<1x1x64x32xf32> to vector<64x32xf32>
    %cst_140 = arith.constant dense<0.000000e+00> : vector<16x32xf32>
    %260 = tpu.matmul %257, %259, %cst_140 {dimension_numbers = #tpu.dot_dimension_numbers<[1], [0], [0], [1], [0, 0, 1, 1], [], []>} : vector<16x64xf32>, vector<64x32xf32>, vector<16x32xf32> -> vector<16x32xf32>
    %c0_141 = arith.constant 0 : index
    %c1_142 = arith.constant 1 : index
    %c0_143 = arith.constant 0 : index
    %c0_144 = arith.constant 0 : index
    %261 = vector.load %arg12[%c0_141, %c1_142, %c0_143, %c0_144] : memref<1x2x1x32xf32, #tpu.memory_space<vmem>>, vector<1x1x1x32xf32>
    %262 = vector.shape_cast %261 : vector<1x1x1x32xf32> to vector<1x32xf32>
    %263 = vector.broadcast %262 : vector<1x32xf32> to vector<16x32xf32>
    %264 = arith.addf %260, %263 : vector<16x32xf32>
    %265 = arith.addf %237, %264 : vector<16x32xf32>
    %c0_145 = arith.constant 0 : index
    %c1_146 = arith.constant 1 : index
    %c0_147 = arith.constant 0 : index
    %c0_148 = arith.constant 0 : index
    %266 = vector.load %arg13[%c0_145, %c1_146, %c0_147, %c0_148] : memref<1x2x1x32xf32, #tpu.memory_space<vmem>>, vector<1x1x1x32xf32>
    %267 = vector.shape_cast %266 : vector<1x1x1x32xf32> to vector<1x32xf32>
    %c0_149 = arith.constant 0 : index
    %c1_150 = arith.constant 1 : index
    %c0_151 = arith.constant 0 : index
    %c0_152 = arith.constant 0 : index
    %268 = vector.load %arg14[%c0_149, %c1_150, %c0_151, %c0_152] : memref<1x2x1x32xf32, #tpu.memory_space<vmem>>, vector<1x1x1x32xf32>
    %269 = vector.shape_cast %268 : vector<1x1x1x32xf32> to vector<1x32xf32>
    %cst_153 = arith.constant dense<0.000000e+00> : vector<16xf32>
    %270 = vector.multi_reduction <add>, %265, %cst_153 [1] : vector<16x32xf32> to vector<16xf32>
    %271 = vector.shape_cast %270 : vector<16xf32> to vector<16x1xf32>
    %cst_154 = arith.constant 3.200000e+01 : f32
    %272 = vector.broadcast %cst_154 : f32 to vector<16x1xf32>
    %273 = arith.divf %271, %272 : vector<16x1xf32>
    %274 = vector.broadcast %273 : vector<16x1xf32> to vector<16x32xf32>
    %275 = arith.subf %265, %274 : vector<16x32xf32>
    %276 = arith.mulf %275, %275 : vector<16x32xf32>
    %cst_155 = arith.constant dense<0.000000e+00> : vector<16xf32>
    %277 = vector.multi_reduction <add>, %276, %cst_155 [1] : vector<16x32xf32> to vector<16xf32>
    %278 = vector.shape_cast %277 : vector<16xf32> to vector<16x1xf32>
    %cst_156 = arith.constant 3.200000e+01 : f32
    %279 = vector.broadcast %cst_156 : f32 to vector<16x1xf32>
    %280 = arith.divf %278, %279 : vector<16x1xf32>
    %281 = vector.broadcast %273 : vector<16x1xf32> to vector<16x32xf32>
    %282 = arith.subf %265, %281 : vector<16x32xf32>
    %cst_157 = arith.constant 9.99999996E-13 : f32
    %283 = vector.broadcast %cst_157 : f32 to vector<16x1xf32>
    %284 = arith.addf %280, %283 : vector<16x1xf32>
    %285 = math.rsqrt %284 : vector<16x1xf32>
    %286 = vector.broadcast %285 : vector<16x1xf32> to vector<16x32xf32>
    %287 = arith.mulf %282, %286 : vector<16x32xf32>
    %288 = vector.broadcast %267 : vector<1x32xf32> to vector<16x32xf32>
    %289 = arith.mulf %287, %288 : vector<16x32xf32>
    %290 = vector.broadcast %269 : vector<1x32xf32> to vector<16x32xf32>
    %291 = arith.addf %289, %290 : vector<16x32xf32>
    %292 = vector.shape_cast %291 : vector<16x32xf32> to vector<2x8x32xf32>
    %293 = vector.shape_cast %1 : vector<2x8xf32> to vector<2x8x1xf32>
    %294 = vector.broadcast %293 : vector<2x8x1xf32> to vector<2x8x32xf32>
    %295 = arith.mulf %292, %294 : vector<2x8x32xf32>
    %cst_158 = arith.constant dense<0.000000e+00> : vector<2x32xf32>
    %296 = vector.multi_reduction <add>, %295, %cst_158 [1] : vector<2x8x32xf32> to vector<2x32xf32>
    %cst_159 = arith.constant dense<0.000000e+00> : vector<2xf32>
    %297 = vector.multi_reduction <add>, %1, %cst_159 [1] : vector<2x8xf32> to vector<2xf32>
    %298 = vector.shape_cast %297 : vector<2xf32> to vector<2x1xf32>
    %299 = vector.broadcast %298 : vector<2x1xf32> to vector<2x32xf32>
    %300 = arith.divf %296, %299 : vector<2x32xf32>
    %c0_160 = arith.constant 0 : index
    %c0_161 = arith.constant 0 : index
    %c0_162 = arith.constant 0 : index
    %301 = vector.load %arg15[%c0_160, %c0_161, %c0_162] : memref<1x2x32xf32, #tpu.memory_space<vmem>>, vector<1x2x32xf32>
    %302 = vector.shape_cast %301 : vector<1x2x32xf32> to vector<2x32xf32>
    %303 = vector.shape_cast %300 : vector<2x32xf32> to vector<1x2x32xf32>
    tpu.vector_store %arg15[%c0_160, %c0_161, %c0_162], %303 {strides = array<i32>} : memref<1x2x32xf32, #tpu.memory_space<vmem>>, vector<1x2x32xf32>,
    return
  }
  func.func @transform_0(%arg0: i32) -> (i32, i32, i32, i32) {
    %c0_i32 = arith.constant 0 : i32
    %c0_i32_0 = arith.constant 0 : i32
    %c0_i32_1 = arith.constant 0 : i32
    %c0_i32_2 = arith.constant 0 : i32
    return %arg0, %c0_i32, %c0_i32_0, %c0_i32_1 : i32, i32, i32, i32
  }
  func.func @transform_1(%arg0: i32) -> (i32, i32, i32) {
    %c0_i32 = arith.constant 0 : i32
    %c0_i32_0 = arith.constant 0 : i32
    %c0_i32_1 = arith.constant 0 : i32
    return %arg0, %c0_i32, %c0_i32_0 : i32, i32, i32
  }
  func.func @transform_2(%arg0: i32) -> (i32, i32, i32, i32) {
    %c0_i32 = arith.constant 0 : i32
    %c0_i32_0 = arith.constant 0 : i32
    %c0_i32_1 = arith.constant 0 : i32
    %c0_i32_2 = arith.constant 0 : i32
    return %arg0, %c0_i32, %c0_i32_0, %c0_i32_1 : i32, i32, i32, i32
  }
  func.func @transform_3(%arg0: i32) -> (i32, i32, i32, i32) {
    %c0_i32 = arith.constant 0 : i32
    %c0_i32_0 = arith.constant 0 : i32
    %c0_i32_1 = arith.constant 0 : i32
    %c0_i32_2 = arith.constant 0 : i32
    return %arg0, %c0_i32, %c0_i32_0, %c0_i32_1 : i32, i32, i32, i32
  }
  func.func @transform_4(%arg0: i32) -> (i32, i32, i32, i32) {
    %c0_i32 = arith.constant 0 : i32
    %c0_i32_0 = arith.constant 0 : i32
    %c0_i32_1 = arith.constant 0 : i32
    %c0_i32_2 = arith.constant 0 : i32
    return %arg0, %c0_i32, %c0_i32_0, %c0_i32_1 : i32, i32, i32, i32
  }
  func.func @transform_5(%arg0: i32) -> (i32, i32, i32, i32) {
    %c0_i32 = arith.constant 0 : i32
    %c0_i32_0 = arith.constant 0 : i32
    %c0_i32_1 = arith.constant 0 : i32
    %c0_i32_2 = arith.constant 0 : i32
    return %arg0, %c0_i32, %c0_i32_0, %c0_i32_1 : i32, i32, i32, i32
  }
  func.func @transform_6(%arg0: i32) -> (i32, i32, i32, i32) {
    %c0_i32 = arith.constant 0 : i32
    %c0_i32_0 = arith.constant 0 : i32
    %c0_i32_1 = arith.constant 0 : i32
    %c0_i32_2 = arith.constant 0 : i32
    return %arg0, %c0_i32, %c0_i32_0, %c0_i32_1 : i32, i32, i32, i32
  }
  func.func @transform_7(%arg0: i32) -> (i32, i32, i32, i32) {
    %c0_i32 = arith.constant 0 : i32
    %c0_i32_0 = arith.constant 0 : i32
    %c0_i32_1 = arith.constant 0 : i32
    %c0_i32_2 = arith.constant 0 : i32
    return %arg0, %c0_i32, %c0_i32_0, %c0_i32_1 : i32, i32, i32, i32
  }
  func.func @transform_8(%arg0: i32) -> (i32, i32, i32, i32) {
    %c0_i32 = arith.constant 0 : i32
    %c0_i32_0 = arith.constant 0 : i32
    %c0_i32_1 = arith.constant 0 : i32
    %c0_i32_2 = arith.constant 0 : i32
    return %arg0, %c0_i32, %c0_i32_0, %c0_i32_1 : i32, i32, i32, i32
  }
  func.func @transform_9(%arg0: i32) -> (i32, i32, i32, i32) {
    %c0_i32 = arith.constant 0 : i32
    %c0_i32_0 = arith.constant 0 : i32
    %c0_i32_1 = arith.constant 0 : i32
    %c0_i32_2 = arith.constant 0 : i32
    return %arg0, %c0_i32, %c0_i32_0, %c0_i32_1 : i32, i32, i32, i32
  }
  func.func @transform_10(%arg0: i32) -> (i32, i32, i32, i32) {
    %c0_i32 = arith.constant 0 : i32
    %c0_i32_0 = arith.constant 0 : i32
    %c0_i32_1 = arith.constant 0 : i32
    %c0_i32_2 = arith.constant 0 : i32
    return %arg0, %c0_i32, %c0_i32_0, %c0_i32_1 : i32, i32, i32, i32
  }
  func.func @transform_11(%arg0: i32) -> (i32, i32, i32, i32) {
    %c0_i32 = arith.constant 0 : i32
    %c0_i32_0 = arith.constant 0 : i32
    %c0_i32_1 = arith.constant 0 : i32
    %c0_i32_2 = arith.constant 0 : i32
    return %arg0, %c0_i32, %c0_i32_0, %c0_i32_1 : i32, i32, i32, i32
  }
  func.func @transform_12(%arg0: i32) -> (i32, i32, i32, i32) {
    %c0_i32 = arith.constant 0 : i32
    %c0_i32_0 = arith.constant 0 : i32
    %c0_i32_1 = arith.constant 0 : i32
    %c0_i32_2 = arith.constant 0 : i32
    return %arg0, %c0_i32, %c0_i32_0, %c0_i32_1 : i32, i32, i32, i32
  }
  func.func @transform_13(%arg0: i32) -> (i32, i32, i32, i32) {
    %c0_i32 = arith.constant 0 : i32
    %c0_i32_0 = arith.constant 0 : i32
    %c0_i32_1 = arith.constant 0 : i32
    %c0_i32_2 = arith.constant 0 : i32
    return %arg0, %c0_i32, %c0_i32_0, %c0_i32_1 : i32, i32, i32, i32
  }
  func.func @transform_14(%arg0: i32) -> (i32, i32, i32) {
    %c0_i32 = arith.constant 0 : i32
    %c0_i32_0 = arith.constant 0 : i32
    %c0_i32_1 = arith.constant 0 : i32
    return %arg0, %c0_i32, %c0_i32_0 : i32, i32, i32
  }
}

</mosaic_0001>

<bundles_post_ra>
// kernel: dual_encoder_forward.1
= control target key start
LH: loop header
LB: loop body
LE: loop exit
PB: predicated region body
PF: predicated region fallthrough
CT: control target
= control target key end

     0   :  { %s3972_s29 = smov 0   ;;  %s4371_s0 = inlined_call_operand.vmem [shape: f32[2,2,8,32], index: 0, kind: input, shape index: {}]   ;;  %s4372_s1 = inlined_call_operand.vmem [shape: f32[2,2,8], index: 1, kind: input, shape index: {}]   ;;  %s4373_s2 = inlined_call_operand.vmem [shape: f32[2,2,32,96], index: 2, kind: input, shape index: {}]   ;;  %s4374_s3 = inlined_call_operand.vmem [shape: f32[2,2,1,96], index: 3, kind: input, shape index: {}]   ;;  %s4375_s4 = inlined_call_operand.vmem [shape: f32[2,2,32,32], index: 4, kind: input, shape index: {}]   ;;  %s4376_s5 = inlined_call_operand.vmem [shape: f32[2,2,1,32], index: 5, kind: input, shape index: {}]   ;;  %s4377_s6 = inlined_call_operand.vmem [shape: f32[2,2,1,32], index: 6, kind: input, shape index: {}]   ;;  %s4378_s7 = inlined_call_operand.vmem [shape: f32[2,2,1,32], index: 7, kind: input, shape index: {}]   ;;  %s4379_s8 = inlined_call_operand.vmem [shape: f32[2,2,32,64], index: 8, kind: input, shape index: {}]   ;;  %s4380_s9 = inlined_call_operand.vmem [shape: f32[2,2,1,64], index: 9, kind: input, shape index: {}]   ;;  %s4381_s10 = inlined_call_operand.vmem [shape: f32[2,2,64,32], index: 10, kind: input, shape index: {}]   ;;  %s4382_s11 = inlined_call_operand.vmem [shape: f32[2,2,1,32], index: 11, kind: input, shape index: {}]   ;;  %s4383_s12 = inlined_call_operand.vmem [shape: f32[2,2,1,32], index: 12, kind: input, shape index: {}]   ;;  %s4384_s13 = inlined_call_operand.vmem [shape: f32[2,2,1,32], index: 13, kind: input, shape index: {}]   ;;  %s4385_s14 = inlined_call_operand.vmem [shape: f32[2,2,32], index: 14, kind: output, shape index: {}]  }
   0x1   :  { %4398 = sst [smem:[#allocation2_spill]] %s4371_s0 }
   0x2   :  { %4399 = sst [smem:[#allocation3_spill]] %s4372_s1 }
   0x3 LB: > { %s3334_s30 = sadd.s32 4294967295, %s3886_s29   ;;  %p3338_p0 = scmp.ge.s32.totalorder %s3886_s29, 1  ;;  %s3886_s29 = sphi %s3972_s29, %s24_s29  }
   0x4   : > { %p533_p1 = scmp.lt.s32.totalorder %s3886_s29, 3 }
   0x6   : > { %p534_p2 = pnand %p3338_p0, %p533_p1 }
   0x7   : > { %p634_p3 = scmp.lt.s32.totalorder (!%p534_p2), %s3334_s30, 1  ;;  %vm741_vm0 = vcmask (!%p534_p2), 261120   ;;  %s4400_s0 = sld [smem:[#allocation2_spill]] (!%p534_p2)  ;;  %v3888_v8 = vmov (!%p534_p2), 0.0   ;;  %vm3889_vm1 = vmmov (!%p534_p2), 0   ;;  %vm826_vm2 = vcmask (!%p534_p2), 130048  }
   0x8   : > { %537 = sbr.rel (%p534_p2) target bundleno = 6122 (0x17ea), region = 76  ;;  %3559 = vmatprep.subr.mxu0 (!%p534_p2), %v3888_v8  ;;  %3561 = vmatprep.mubr.msk.f32.mxu0 (!%p534_p2), %vm3889_vm1, %v3888_v8  ;;  %s4396_s27 = smov (!%p534_p2), 96   ;;  %v3891_v16 = vmov (!%p534_p2), 1966171168   ;;  %v705_v18 = vlaneseq (!%p534_p2)  ;;  %vm994_vm3 = vcmask (!%p534_p2), 64512   ;;  %vm1777_vm4 = vcmask (!%p534_p2), 523264  }
   0x9   : > { %v703_v17 = vunpack.c.l.s4 (!%p534_p2), %v3891_v16  ;;  %s4401_s1 = sld [smem:[#allocation3_spill]] (!%p534_p2)  ;;  %s4392_s20 = smov (!%p534_p2), 80   ;;  %vm3105_vm5 = vcmask (!%p534_p2), 58368   ;;  %vm3120_vm6 = vcmask (!%p534_p2), 1041409   ;;  %vm3123_vm7 = vcmask (!%p534_p2), 254976  }
   0xa   : > { %v4049_v20 = vshrl.u32 (!%p534_p2), %v705_v18, 7  ;;  %s4390_s21 = smov (!%p534_p2), 112   ;;  %s4388_s16 = smov (!%p534_p2), 16  }
   0xb   : > { %v704_v19 = vunpack.c.0.s8 (!%p534_p2), %v703_v17 }
   0xc   : > { %v4054_v28 = vsub.s32 (!%p534_p2), 0, %v4049_v20 }
   0xd   : > { %v707_v23 = vsub.s32 (!%p534_p2), %v704_v19, %v4049_v20 }
   0xf   : > { %s4409_s30 = smov (!%p634_p3, %s3334_s30), 1 }
  0x10   : > { %s3983_s15 = sshll.u32 %s4409_s30, 6  ;;  %s3445_s19 = sshll.u32 %s4409_s30, 4 }
  0x11   : > { %s3989_s18 = scalar_lea.vmem %s4373_s2, %s3983_s15  ;;  %s638_s22 = scalar_lea.vmem %s4400_s0, %s3445_s19 }
  0x12   : > { %v730_v0 = vld [vmem:[%s3989_s18] sm:$0xff]  ;;  %v731_v1 = vld [vmem:[%s3989_s18 + $0x8] sm:$0xff]  ;;  %v732_v2 = vld [vmem:[%s3989_s18 + $0x10] sm:$0xff]  ;;  %s4014_s23 = sshll.u32 %s4409_s30, 1  ;;  %s4394_s19 = smov 64  }
  0x13   : > { %v3722_v3 = vpack.c.bf16 %v731_v1, %v730_v0  ;;  %v733_v4 = vld [vmem:[%s3989_s18 + $0x18] sm:$0xff]  ;;  %v3999_v6 = vld [vmem:[%s638_s22] sm:$0xff]  ;;  %v4003_v7 = vld [vmem:[%s638_s22 + $0x8] sm:$0xff]  ;;  %s4020_s26 = scalar_lea.vmem %s4374_s3, %s4014_s23  ;;  %s4047_s17 = scalar_lea.vmem %s4401_s1, %s4014_s23 }
  0x14   : > { %v3726_v5 = vpack.c.bf16 %v733_v4, %v732_v2  ;;  %3546 = vmatprep.mubr.msk.f32.mxu1 %vm741_vm0, %v3999_v6  ;;  %v3359_v9 = vld [vmem:[%s4020_s26] ss:$0 sm:$0xff]  ;;  %s4386_s22 = smov 48   ;;  %s4118_s28 = scalar_lea.vmem %s4375_s4, %s3983_s15 }
  0x15   : > { %3723 = vmatprep.subr.bf16.mxu1 %v3722_v3  ;;  %v699_v21 = vld [vmem:[%s4047_s17] sm:$0x3]  ;;  %s4159_s25 = scalar_lea.vmem %s4377_s6, %s4014_s23  ;;  %s4227_s1 = scalar_lea.vmem %s4384_s13, %s4014_s23 }
  0x16   : > { %3725 = vmatpush3.bf16.msra.mxu1 %v3722_v3  ;;  %v700_v22 = vsub.f32 1.0, %v699_v21  ;;  %s4402_s0 = smov 96  }
  0x17   : > { %3727 = vmatprep.subr.bf16.mxu1 %v3726_v5 }
  0x18   : > { %v708_v24 = vrot.slane %v700_v22, %v707_v23 }
  0x1a   : > { %3729 = vmatpush3.bf16.msra.mxu1 %v3726_v5  ;;  %v716_v25 = vrot.slane %v708_v24, %v707_v23  ;;  %v709_v26 = vcombine.high %v708_v24, %v708_v24 }
  0x1b   : > { %3549 = vmatprep.subr.mxu1 %v3888_v8 }
  0x1c   : > { %v726_v27 = vmul.f32 -1e+09, %v716_v25  ;;  %v723_v29 = vrot.slane %v709_v26, %v707_v23 }
  0x1d   : > { %3547 = vmatmul.mubr.msk.f32.vlgmr.msra.gmra.mrb[0].mxu1 %vm741_vm0, %v4003_v7 }
  0x1e   : > { %3551 = vmatprep.mubr.msk.f32.mxu1 %vm3889_vm1, %v3888_v8  ;;  %v4057_v30 = vrot.slane %v726_v27, %v4054_v28  ;;  %v727_v31 = vmul.f32 -1e+09, %v723_v29 }
  0x20   : > { %v4061_v36 = vrot.slane %v727_v31, %v4054_v28 }
  0xf0   : > { %v3548_v10 = vpop.f32.mrb[0].mxu1 }
  0xf1   : > { %v814_v11 = vpop.f32.mrb[1].mxu1  ;;  %v4027_v13 = vadd.f32 %v3548_v10, %v3359_v9 }
  0xf2   : > { %v4023_v12 = vadd.f32 %v3359_v9, %v814_v11 }
  0xf4   : > { %824 = vrot.lane.b32.xlu0 %v4023_v12, %s4396_s27 }
  0xf8   : > { %902 = vrot.lane.b32.xlu0 %v4027_v13, %s4396_s27  ;;  %s4404_s27 = smov 80  }
 0x166   : > { %v825_v14 = vpop.permute.xlu0 %824 }
 0x167   : > { %3550 = vmatpush3.xpose.msk.msra.mxu1 %vm826_vm2, %v825_v14 }
 0x168   : > { %3554 = vmatprep.subr.mxu1 %v3888_v8 }
 0x16a   : > { %3552 = vmatmul.mubr.msk.f32.vlgmr.msra.gmra.mrb[2].mxu1 %vm826_vm2, %v4023_v12  ;;  %v903_v15 = vpop.permute.xlu0 %902 }
 0x16b   : > { %3555 = vmatpush3.xpose.msk.msra.mxu1 %vm826_vm2, %v903_v15  ;;  %3556 = vmatprep.mubr.msk.f32.mxu1 %vm3889_vm1, %v3888_v8 }
 0x16c   : > { %3564 = vmatprep.subr.mxu1 %v3888_v8 }
 0x16e   : > { %3557 = vmatmul.mubr.msk.f32.vlgmr.msra.gmra.mrb[4].mxu1 %vm826_vm2, %v4027_v13 }
 0x16f   : > { %3566 = vmatprep.mubr.msk.f32.mxu1 %vm3889_vm1, %v3888_v8 }
 0x23d   : > { %v897_v32 = vpop.f32.mrb[2].mxu1 }
 0x23e   : > { %v978_v33 = vmul.f32 0.25, %v897_v32  ;;  %v3553_v34 = vpop.f32.mrb[3].mxu1 }
 0x240   : > { %v992_v35 = vadd.f32 %v4057_v30, %v978_v33 }
 0x241   : > { %v974_v37 = vpop.f32.mrb[4].mxu1 }
 0x242   : > { %v979_v38 = vmul.f32 0.25, %v974_v37  ;;  %v3558_v39 = vpop.f32.mrb[5].mxu1  ;;  %v995_v40 = vsel %vm994_vm3, %v992_v35, -inf }
 0x243   : > { %996 = vmax.xlane.f32.xlu1 %v995_v40 }
 0x244   : > { %v993_v41 = vadd.f32 %v4061_v36, %v979_v38 }
 0x246   : > { %v998_v42 = vsel %vm994_vm3, %v993_v41, -inf }
 0x247   : > { %999 = vmax.xlane.f32.xlu1 %v998_v42 }
 0x258   : > { %1017 = vrot.lane.b32.xlu1 %v4023_v12, %s4394_s19 }
 0x25c   : > { %1093 = vrot.lane.b32.xlu1 %v4027_v13, %s4394_s19  ;;  %s4165_s19 = scalar_lea.vmem %s4378_s7, %s4014_s23 }
 0x260   : > { %1171 = vrot.lane.b32.xlu1 %v4023_v12, %s4392_s20 }
 0x264   : > { %1249 = vrot.lane.b32.xlu1 %v4027_v13, %s4392_s20  ;;  %s3449_s20 = sshll.u32 %s4409_s30, 7  ;;  %s4406_s30 = smov 48  }
 0x265   : > { %s4178_s24 = scalar_lea.vmem %s4381_s10, %s3449_s20  ;;  %s4204_s20 = scalar_lea.vmem %s4382_s11, %s4014_s23 }
 0x2d0   : > { %v997_v43 = vpop.xlane.xlu1 %996 }
 0x2d1   : > { %v1001_v44 = vsub.f32 %v992_v35, %v997_v43  ;;  %v1515_v43 = vld [vmem:[%s4118_s28 + $0x10] sm:$0xff] }
 0x2d3   : > { %v1003_v45 = vmul.f32 1.442695, %v1001_v44  ;;  %v1516_v44 = vld [vmem:[%s4118_s28 + $0x18] sm:$0xff] }
 0x2d4   : > { %v1000_v46 = vpop.xlane.xlu1 %999 }
 0x2d5   : > { %3819 = vpow2.f32 %v1003_v45  ;;  %v1002_v47 = vsub.f32 %v993_v41, %v1000_v46  ;;  %v1514_v41 = vld [vmem:[%s4118_s28 + $0x8] sm:$0xff]  ;;  %v3734_v45 = vpack.c.bf16 %v1516_v44, %v1515_v43 }
 0x2d6   : > { %v1767_v43 = vld [vmem:[%s4178_s24 + $0x28] sm:$0xff] }
 0x2d7   : > { %v1005_v48 = vmul.f32 1.442695, %v1002_v47 }
 0x2d8   : > { %v1018_v49 = vpop.permute.xlu1 %1017 }
 0x2d9   : > { %3821 = vpow2.f32 %v1005_v48  ;;  %3560 = vmatpush3.msra.mxu0 %v1018_v49 }
 0x2da   : > { %3569 = vmatprep.subr.mxu0 %v3888_v8 }
 0x2dc   : > { %v1094_v50 = vpop.permute.xlu1 %1093 }
 0x2dd   : > { %3565 = vmatpush3.msra.mxu1 %v1094_v50 }
 0x2de   : > { %3574 = vmatprep.subr.mxu1 %v3888_v8 }
 0x2df   : > { %v3820_v51 = vpop.eup %3819 }
 0x2e0   : > { %v1007_v52 = vsel %vm994_vm3, %v3820_v51, 0.0  ;;  %v1172_v55 = vpop.permute.xlu1 %1171 }
 0x2e1   : > { %1008 = vadd.xlane.f32.xlu0 %v1007_v52 }
 0x2e3   : > { %v3822_v53 = vpop.eup %3821 }
 0x2e4   : > { %v1010_v54 = vsel %vm994_vm3, %v3822_v53, 0.0  ;;  %v1250_v56 = vpop.permute.xlu1 %1249 }
 0x2e5   : > { %1011 = vadd.xlane.f32.xlu1 %v1010_v54 }
 0x2f6   : > { %1247 = vrot.lane.b32.xlu1 %v4027_v13, %s4390_s21 }
 0x2f7   : > { %1169 = vrot.lane.b32.xlu0 %v4023_v12, %s4390_s21  ;;  %s4193_s21 = scalar_lea.vmem %s4380_s9, %s4014_s23 }
 0x36e   : > { %v1009_v57 = vpop.xlane.xlu0 %1008 }
 0x36f   : > { %3823 = vrcp.f32 %v1009_v57 }
 0x372   : > { %v1012_v58 = vpop.xlane.xlu1 %1011  ;;  %v1170_v63 = vpop.permute.xlu0 %1169 }
 0x373   : > { %3825 = vrcp.f32 %v1012_v58 }
 0x376   : > { %v1248_v0 = vpop.permute.xlu1 %1247 }
 0x379   : > { %v3824_v59 = vpop.eup %3823 }
 0x37a   : > { %v1015_v60 = vmul.f32 %v3824_v59, %v3820_v51 }
 0x37c   : > { %3562 = vmatmul.mubr.msk.f32.vlgmr.msra.gmra.mrb[0].mxu0 %vm994_vm3, %v1015_v60 }
 0x37d   : > { %v3826_v61 = vpop.eup %3825  ;;  %3570 = vmatpush3.xpose.msk.msra.mxu0 %vm826_vm2, %v1172_v55  ;;  %3571 = vmatprep.mubr.msk.f32.mxu0 %vm3889_vm1, %v3888_v8 }
 0x37e   : > { %v1016_v62 = vmul.f32 %v3826_v61, %v3822_v53  ;;  %3579 = vmatprep.subr.mxu0 %v3888_v8 }
 0x380   : > { %3567 = vmatmul.mubr.msk.f32.vlgmr.msra.gmra.mrb[6].mxu1 %vm994_vm3, %v1016_v62  ;;  %3572 = vmatmul.mubr.msk.f32.vlgmr.msra.gmra.mrb[2].mxu0 %vm826_vm2, %v1170_v63 }
 0x381   : > { %3575 = vmatpush3.xpose.msk.msra.mxu1 %vm826_vm2, %v1250_v56  ;;  %3576 = vmatprep.mubr.msk.f32.mxu1 %vm3889_vm1, %v3888_v8 }
 0x382   : > { %3584 = vmatprep.subr.mxu1 %v3888_v8  ;;  %3581 = vmatprep.mubr.msk.f32.mxu0 %vm3889_vm1, %v3888_v8 }
 0x384   : > { %3577 = vmatmul.mubr.msk.f32.vlgmr.msra.gmra.mrb[8].mxu1 %vm826_vm2, %v1248_v0 }
 0x385   : > { %3586 = vmatprep.mubr.msk.f32.mxu1 %vm3889_vm1, %v3888_v8 }
 0x44f   : > { %v4098_v1 = vpop.f32.mrb[0].mxu0 }
 0x450   : > { %v3563_v2 = vpop.f32.mrb[1].mxu0 }
 0x453   : > { %v4100_v3 = vpop.f32.mrb[6].mxu1  ;;  %v1243_v4 = vpop.f32.mrb[2].mxu0 }
 0x454   : > { %v1325_v5 = vmul.f32 0.25, %v1243_v4  ;;  %v3568_v9 = vpop.f32.mrb[7].mxu1  ;;  %v3573_v10 = vpop.f32.mrb[3].mxu0 }
 0x456   : > { %v1327_v11 = vadd.f32 %v1325_v5, %v4057_v30 }
 0x457   : > { %v1321_v14 = vpop.f32.mrb[8].mxu1 }
 0x458   : > { %v1326_v15 = vmul.f32 0.25, %v1321_v14  ;;  %v3578_v16 = vpop.f32.mrb[9].mxu1  ;;  %v1329_v17 = vsel %vm994_vm3, %v1327_v11, -inf }
 0x459   : > { %1330 = vmax.xlane.f32.xlu1 %v1329_v17 }
 0x45a   : > { %v1328_v18 = vadd.f32 %v1326_v15, %v4061_v36 }
 0x45c   : > { %v1332_v19 = vsel %vm994_vm3, %v1328_v18, -inf }
 0x45d   : > { %1333 = vmax.xlane.f32.xlu0 %v1332_v19 }
 0x473   : > { %1427 = vrot.lane.b32.xlu0 %v4027_v13, %s4386_s22 }
 0x4e6   : > { %v1331_v21 = vpop.xlane.xlu1 %1330 }
 0x4e7   : > { %v1335_v22 = vsub.f32 %v1327_v11, %v1331_v21 }
 0x4e9   : > { %v1337_v23 = vmul.f32 1.442695, %v1335_v22 }
 0x4ea   : > { %v1334_v24 = vpop.xlane.xlu0 %1333 }
 0x4eb   : > { %3827 = vpow2.f32 %v1337_v23  ;;  %v1336_v25 = vsub.f32 %v1328_v18, %v1334_v24 }
 0x4ed   : > { %v1339_v26 = vmul.f32 1.442695, %v1336_v25 }
 0x4ee   : > { %v1428_v27 = vpop.permute.xlu0 %1427 }
 0x4ef   : > { %3829 = vpow2.f32 %v1339_v26  ;;  %3585 = vmatpush3.msra.mxu1 %v1428_v27  ;;  %v3377_v26 = vld [vmem:[%s4159_s25] ss:$0 sm:$0xff] }
 0x4f5   : > { %v3828_v29 = vpop.eup %3827 }
 0x4f6   : > { %v1341_v31 = vsel %vm994_vm3, %v3828_v29, 0.0 }
 0x4f7   : > { %1342 = vadd.xlane.f32.xlu1 %v1341_v31 }
 0x4f9   : > { %v3830_v32 = vpop.eup %3829 }
 0x4fa   : > { %v1344_v33 = vsel %vm994_vm3, %v3830_v32, 0.0 }
 0x4fb   : > { %1345 = vadd.xlane.f32.xlu1 %v1344_v33 }
 0x50c   : > { %1351 = vrot.lane.b32.xlu1 %v4023_v12, %s4386_s22  ;;  %v1513_v12 = vld [vmem:[%s4118_s28] sm:$0xff]  ;;  %s4136_s22 = scalar_lea.vmem %s4376_s5, %s4014_s23 }
 0x50d   : > { %v3730_v42 = vpack.c.bf16 %v1514_v41, %v1513_v12  ;;  %v3374_v54 = vld [vmem:[%s4136_s22] ss:$0 sm:$0xff]  ;;  %v1765_v12 = vld [vmem:[%s4178_s24 + $0x18] sm:$0xff] }
 0x584   : > { %v1343_v13 = vpop.xlane.xlu1 %1342 }
 0x585   : > { %3831 = vrcp.f32 %v1343_v13 }
 0x588   : > { %v1346_v34 = vpop.xlane.xlu1 %1345 }
 0x589   : > { %3833 = vrcp.f32 %v1346_v34 }
 0x58c   : > { %v1352_v35 = vpop.permute.xlu1 %1351 }
 0x58d   : > { %3580 = vmatpush3.msra.mxu0 %v1352_v35 }
 0x58e   : > { %3731 = vmatprep.subr.bf16.mxu0 %v3730_v42 }
 0x58f   : > { %v3832_v37 = vpop.eup %3831 }
 0x590   : > { %v1349_v38 = vmul.f32 %v3832_v37, %v3828_v29  ;;  %v3378_v29 = vld [vmem:[%s4165_s19] ss:$0 sm:$0xff] }
 0x591   : > { %v1762_v37 = vld [vmem:[%s4178_s24] sm:$0xff] }
 0x592   : > { %3582 = vmatmul.mubr.msk.f32.vlgmr.msra.gmra.mrb[4].mxu0 %vm994_vm3, %v1349_v38  ;;  %v1763_v38 = vld [vmem:[%s4178_s24 + $0x8] sm:$0xff] }
 0x593   : > { %v3834_v39 = vpop.eup %3833  ;;  %3733 = vmatpush3.bf16.msra.mxu0 %v3730_v42  ;;  %v1766_v42 = vld [vmem:[%s4178_s24 + $0x20] sm:$0xff] }
 0x594   : > { %v1350_v40 = vmul.f32 %v3834_v39, %v3830_v32  ;;  %3735 = vmatprep.subr.bf16.mxu0 %v3734_v45  ;;  %v3746_v39 = vpack.c.bf16 %v1763_v38, %v1762_v37  ;;  %v3754_v44 = vpack.c.bf16 %v1767_v43, %v1766_v42 }
 0x596   : > { %3587 = vmatmul.mubr.msk.f32.vlgmr.msra.gmra.mrb[10].mxu1 %vm994_vm3, %v1350_v40  ;;  %v1764_v40 = vld [vmem:[%s4178_s24 + $0x10] sm:$0xff] }
 0x597   : > { %3737 = vmatpush3.bf16.msra.mxu0 %v3734_v45  ;;  %v3750_v41 = vpack.c.bf16 %v1765_v12, %v1764_v40  ;;  %v1768_v45 = vld [vmem:[%s4178_s24 + $0x30] sm:$0xff] }
 0x598   : > { %3747 = vmatprep.subr.bf16.mxu0 %v3746_v39 }
 0x665   : > { %v1423_v46 = vpop.f32.mrb[4].mxu0 }
 0x666   : > { %1505 = vrot.lane.b32.xlu1 %v1423_v46, %s4388_s16  ;;  %v3583_v47 = vpop.f32.mrb[5].mxu0  ;;  %v1769_v46 = vld [vmem:[%s4178_s24 + $0x38] sm:$0xff] }
 0x667   : > { %v3758_v47 = vpack.c.bf16 %v1769_v46, %v1768_v45 }
 0x669   : > { %v1499_v48 = vpop.f32.mrb[10].mxu1 }
 0x66a   : > { %1507 = vrot.lane.b32.xlu1 %v1499_v48, %s4388_s16  ;;  %v3588_v49 = vpop.f32.mrb[11].mxu1  ;;  %s4149_s16 = scalar_lea.vmem %s4379_s8, %s3983_s15  ;;  %v3379_v48 = vld [vmem:[%s4193_s21] ss:$0 sm:$0xff]  ;;  %s4405_s15 = smov 112  }
 0x66b   : > { %v1653_v11 = vld [vmem:[%s4149_s16 + $0x8] sm:$0xff]  ;;  %v1654_v15 = vld [vmem:[%s4149_s16 + $0x10] sm:$0xff]  ;;  %v1655_v16 = vld [vmem:[%s4149_s16 + $0x18] sm:$0xff] }
 0x66c   : > { %v3742_v17 = vpack.c.bf16 %v1655_v16, %v1654_v15 }
 0x6d8   : > { %v1506_v50 = vpop.permute.xlu1 %1505 }
 0x6d9   : > { %v1511_v51 = vsel %vm826_vm2, %v4098_v1, %v1506_v50 }
 0x6da   : > { %3597 = vmatprep.mubr.msk.f32.mxu0 %vm741_vm0, %v1511_v51 }
 0x6dc   : > { %v1508_v52 = vpop.permute.xlu1 %1507 }
 0x6dd   : > { %v1512_v53 = vsel %vm826_vm2, %v4100_v3, %v1508_v52 }
 0x6de   : > { %3598 = vmatmul.mubr.msk.f32.vlgmr.msra.gmra.mrb[6].mxu0 %vm741_vm0, %v1512_v53 }
 0x6df   : > { %3749 = vmatpush3.bf16.msra.mxu0 %v3746_v39 }
 0x6e0   : > { %3751 = vmatprep.subr.bf16.mxu0 %v3750_v41 }
 0x6e3   : > { %3753 = vmatpush3.bf16.msra.mxu0 %v3750_v41 }
 0x6e4   : > { %3755 = vmatprep.subr.bf16.mxu0 %v3754_v44 }
 0x6e7   : > { %3757 = vmatpush3.bf16.msra.mxu0 %v3754_v44 }
 0x6e8   : > { %3759 = vmatprep.subr.bf16.mxu0 %v3758_v47 }
 0x6eb   : > { %3761 = vmatpush3.bf16.msra.mxu0 %v3758_v47 }
 0x6ec   : > { %3651 = vmatprep.subr.mxu0 %v3888_v8 }
 0x7b1   : > { %v3599_v55 = vpop.f32.mrb[6].mxu0 }
 0x7b2   : > { %v1602_v56 = vadd.f32 %v3599_v55, %v3374_v54  ;;  %v1596_v57 = vpop.f32.mrb[7].mxu0 }
 0x7b3   : > { %v1597_v58 = vadd.f32 %v3374_v54, %v1596_v57 }
 0x7b4   : > { %v1606_v59 = vadd.f32 %v1602_v56, %v4003_v7  ;;  %v1652_v7 = vld [vmem:[%s4149_s16] sm:$0xff] }
 0x7b5   : > { %v1605_v60 = vadd.f32 %v1597_v58, %v3999_v6  ;;  %v3738_v14 = vpack.c.bf16 %v1653_v11, %v1652_v7 }
 0x7b6   : > { %v1612_v61 = vsel %vm741_vm0, %v1606_v59, 0.0 }
 0x7b7   : > { %1613 = vadd.xlane.f32.xlu1 %v1612_v61  ;;  %v1609_v62 = vsel %vm741_vm0, %v1605_v60, 0.0  ;;  %3739 = vmatprep.subr.bf16.mxu1 %v3738_v14 }
 0x7b8   : > { %1610 = vadd.xlane.f32.xlu0 %v1609_v62  ;;  %3741 = vmatpush3.bf16.msra.mxu1 %v3738_v14 }
 0x7b9   : > { %3743 = vmatprep.subr.bf16.mxu1 %v3742_v17 }
 0x7bc   : > { %3745 = vmatpush3.bf16.msra.mxu1 %v3742_v17 }
 0x844   : > { %v1614_v63 = vpop.xlane.xlu1 %1613 }
 0x845   : > { %v1617_v0 = vmul.f32 0.03125, %v1614_v63  ;;  %v1611_v1 = vpop.xlane.xlu0 %1610 }
 0x846   : > { %v1616_v2 = vmul.f32 0.03125, %v1611_v1 }
 0x847   : > { %v1619_v3 = vsub.f32 %v1606_v59, %v1617_v0 }
 0x848   : > { %v1618_v4 = vsub.f32 %v1605_v60, %v1616_v2 }
 0x849   : > { %v1621_v10 = vmul.f32 %v1619_v3, %v1619_v3 }
 0x84a   : > { %v1620_v5 = vmul.f32 %v1618_v4, %v1618_v4 }
 0x84b   : > { %v1625_v6 = vsel %vm741_vm0, %v1621_v10, 0.0  ;;  %v3382_v10 = vld [vmem:[%s4204_s20] ss:$0 sm:$0xff] }
 0x84c   : > { %v1622_v9 = vsel %vm741_vm0, %v1620_v5, 0.0 }
 0x84d   : > { %1623 = vadd.xlane.f32.xlu0 %v1622_v9 }
 0x851   : > { %1626 = vadd.xlane.f32.xlu0 %v1625_v6 }
 0x8da   : > { %v1624_v18 = vpop.xlane.xlu0 %1623 }
 0x8db   : > { %v1628_v19 = vmul.f32 0.03125, %v1624_v18 }
 0x8dd   : > { %v1630_v21 = vadd.f32 1e-12, %v1628_v19 }
 0x8de   : > { %v1627_v22 = vpop.xlane.xlu0 %1626 }
 0x8df   : > { %3835 = vrsqrt.f32 %v1630_v21  ;;  %v1629_v23 = vmul.f32 0.03125, %v1627_v22 }
 0x8e1   : > { %v1631_v24 = vadd.f32 1e-12, %v1629_v23 }
 0x8e3   : > { %3837 = vrsqrt.f32 %v1631_v24 }
 0x8e9   : > { %v3836_v25 = vpop.eup %3835 }
 0x8ea   : > { %v1634_v27 = vmul.f32 %v3836_v25, %v1618_v4 }
 0x8ec   : > { %v1642_v31 = vmul.f32 %v3377_v26, %v1634_v27 }
 0x8ed   : > { %v3838_v32 = vpop.eup %3837 }
 0x8ee   : > { %v1635_v33 = vmul.f32 %v3838_v32, %v1619_v3  ;;  %v4169_v13 = vadd.f32 %v3378_v29, %v1642_v31  ;;  %v3387_v32 = vld [vmem:[%s3989_s18 + $0x20] sm:$0xff] }
 0x8f0   : > { %v1643_v34 = vmul.f32 %v3377_v26, %v1635_v33  ;;  %3608 = vmatprep.mubr.msk.f32.mxu1 %vm741_vm0, %v4169_v13  ;;  %v3388_v33 = vld [vmem:[%s3989_s18 + $0x28] sm:$0xff] }
 0x8f2   : > { %v1651_v35 = vadd.f32 %v3378_v29, %v1643_v34  ;;  %v3389_v34 = vld [vmem:[%s3989_s18 + $0x30] sm:$0xff] }
 0x8f4   : > { %3609 = vmatmul.mubr.msk.f32.vlgmr.msra.gmra.mrb[12].mxu1 %vm741_vm0, %v1651_v35 }
 0x9c7   : > { %v3610_v49 = vpop.f32.mrb[12].mxu1 }
 0x9c8   : > { %v1741_v50 = vadd.f32 %v3610_v49, %v3379_v48  ;;  %v1735_v51 = vpop.f32.mrb[13].mxu1 }
 0x9c9   : > { %v1736_v52 = vadd.f32 %v3379_v48, %v1735_v51  ;;  %v3386_v48 = vld [vmem:[%s4227_s1] ss:$0 sm:$0xff] }
 0x9ca   : > { %v1745_v53 = vmul.f32 %v1741_v50, %v1741_v50 }
 0x9cb   : > { %v1744_v54 = vmul.f32 %v1736_v52, %v1736_v52 }
 0x9cc   : > { %v1747_v55 = vmul.f32 %v1745_v53, %v1741_v50  ;;  %v3392_v53 = vld [vmem:[%s4020_s26 + $0x1] ss:$0 sm:$0xff]  ;;  %s4403_s26 = smov 64  }
 0x9cd   : > { %v1746_v56 = vmul.f32 %v1744_v54, %v1736_v52 }
 0x9ce   : > { %v1749_v57 = vmul.f32 0.044715, %v1747_v55 }
 0x9cf   : > { %v1748_v58 = vmul.f32 0.044715, %v1746_v56 }
 0x9d0   : > { %v1751_v59 = vadd.f32 %v1749_v57, %v1741_v50 }
 0x9d1   : > { %v1750_v60 = vadd.f32 %v1748_v58, %v1736_v52 }
 0x9d2   : > { %v1753_v61 = vmul.f32 0.7978846, %v1751_v59 }
 0x9d3   : > { %v1752_v62 = vmul.f32 0.7978846, %v1750_v60 }
 0x9d4   : > { %3839 = vtanh.f32 %v1753_v61 }
 0x9d5   : > { %3841 = vtanh.f32 %v1752_v62 }
 0x9de   : > { %v3840_v63 = vpop.eup %3839 }
 0x9df   : > { %v3842_v0 = vpop.eup %3841  ;;  %v1757_v1 = vadd.f32 1.0, %v3840_v63 }
 0x9e0   : > { %v1756_v2 = vadd.f32 1.0, %v3842_v0 }
 0x9e1   : > { %v1759_v3 = vmul.f32 0.5, %v1757_v1 }
 0x9e2   : > { %v1758_v4 = vmul.f32 0.5, %v1756_v2 }
 0x9e3   : > { %v1761_v9 = vmul.f32 %v1759_v3, %v1741_v50 }
 0x9e4   : > { %v1760_v5 = vmul.f32 %v1758_v4, %v1736_v52 }
 0x9e6   : > { %3627 = vmatprep.mubr.msk.f32.mxu0 %vm1777_vm4, %v1760_v5 }
 0x9e7   : > { %3628 = vmatmul.mubr.msk.f32.vlgmr.msra.gmra.mrb[8].mxu0 %vm1777_vm4, %v1761_v9 }
 0x9e8   : > { %3653 = vmatprep.mubr.msk.f32.mxu0 %vm3889_vm1, %v3888_v8 }
 0xaba   : > { %v3629_v6 = vpop.f32.mrb[8].mxu0 }
 0xabb   : > { %v1856_v7 = vadd.f32 %v3629_v6, %v3382_v10  ;;  %v1850_v11 = vpop.f32.mrb[9].mxu0 }
 0xabc   : > { %v1851_v14 = vadd.f32 %v3382_v10, %v1850_v11 }
 0xabd   : > { %v1860_v15 = vadd.f32 %v1856_v7, %v1651_v35  ;;  %v3390_v35 = vld [vmem:[%s3989_s18 + $0x38] sm:$0xff]  ;;  %s4221_s18 = scalar_lea.vmem %s4383_s12, %s4014_s23 }
 0xabe   : > { %v1859_v16 = vadd.f32 %v1851_v14, %v4169_v13  ;;  %v3762_v13 = vpack.c.bf16 %v3388_v33, %v3387_v32  ;;  %v3766_v37 = vpack.c.bf16 %v3390_v35, %v3389_v34  ;;  %v3385_v44 = vld [vmem:[%s4221_s18] ss:$0 sm:$0xff] }
 0xabf   : > { %v1866_v17 = vsel %vm741_vm0, %v1860_v15, 0.0 }
 0xac0   : > { %1867 = vadd.xlane.f32.xlu0 %v1866_v17  ;;  %v1863_v18 = vsel %vm741_vm0, %v1859_v16, 0.0  ;;  %3763 = vmatprep.subr.bf16.mxu1 %v3762_v13 }
 0xac1   : > { %1864 = vadd.xlane.f32.xlu1 %v1863_v18  ;;  %3765 = vmatpush3.bf16.msra.mxu1 %v3762_v13 }
 0xac2   : > { %3767 = vmatprep.subr.bf16.mxu1 %v3766_v37 }
 0xac5   : > { %3769 = vmatpush3.bf16.msra.mxu1 %v3766_v37 }
 0xac6   : > { %3641 = vmatprep.subr.mxu1 %v3888_v8 }
 0xb4d   : > { %v1868_v19 = vpop.xlane.xlu0 %1867 }
 0xb4e   : > { %v1870_v21 = vmul.f32 0.03125, %v1868_v19  ;;  %v1865_v22 = vpop.xlane.xlu1 %1864 }
 0xb4f   : > { %v1869_v23 = vmul.f32 0.03125, %v1865_v22 }
 0xb50   : > { %v1872_v24 = vsub.f32 %v1860_v15, %v1870_v21 }
 0xb51   : > { %v1871_v25 = vsub.f32 %v1859_v16, %v1869_v23 }
 0xb52   : > { %v1874_v26 = vmul.f32 %v1872_v24, %v1872_v24 }
 0xb53   : > { %v1873_v27 = vmul.f32 %v1871_v25, %v1871_v25 }
 0xb54   : > { %v1878_v29 = vsel %vm741_vm0, %v1874_v26, 0.0 }
 0xb55   : > { %1879 = vadd.xlane.f32.xlu0 %v1878_v29  ;;  %v1875_v31 = vsel %vm741_vm0, %v1873_v27, 0.0 }
 0xb56   : > { %1876 = vadd.xlane.f32.xlu1 %v1875_v31 }
 0xbe2   : > { %v1880_v38 = vpop.xlane.xlu0 %1879 }
 0xbe3   : > { %v1882_v39 = vmul.f32 0.03125, %v1880_v38  ;;  %v1877_v40 = vpop.xlane.xlu1 %1876 }
 0xbe4   : > { %v1881_v12 = vmul.f32 0.03125, %v1877_v40 }
 0xbe5   : > { %v1884_v41 = vadd.f32 1e-12, %v1882_v39 }
 0xbe6   : > { %v1883_v42 = vadd.f32 1e-12, %v1881_v12 }
 0xbe7   : > { %3843 = vrsqrt.f32 %v1884_v41 }
 0xbe8   : > { %3845 = vrsqrt.f32 %v1883_v42 }
 0xbf1   : > { %v3844_v43 = vpop.eup %3843 }
 0xbf2   : > { %v3846_v45 = vpop.eup %3845  ;;  %v1888_v46 = vmul.f32 %v3844_v43, %v1872_v24 }
 0xbf3   : > { %v1887_v47 = vmul.f32 %v3846_v45, %v1871_v25 }
 0xbf4   : > { %v1896_v49 = vmul.f32 %v3385_v44, %v1888_v46 }
 0xbf5   : > { %v1895_v50 = vmul.f32 %v3385_v44, %v1887_v47 }
 0xbf6   : > { %v4233_v52 = vadd.f32 %v3386_v48, %v1896_v49 }
 0xbf7   : > { %v4231_v51 = vadd.f32 %v3386_v48, %v1895_v50 }
 0xbf9   : > { %3638 = vmatprep.mubr.msk.f32.mxu1 %vm741_vm0, %v4231_v51 }
 0xbfa   : > { %3639 = vmatmul.mubr.msk.f32.vlgmr.msra.gmra.mrb[14].mxu1 %vm741_vm0, %v4233_v52 }
 0xbfb   : > { %3643 = vmatprep.mubr.msk.f32.mxu1 %vm3889_vm1, %v3888_v8 }
 0xccd   : > { %v3640_v54 = vpop.f32.mrb[14].mxu1 }
 0xcce   : > { %v4242_v55 = vadd.f32 %v3640_v54, %v3392_v53  ;;  %v1990_v56 = vpop.f32.mrb[15].mxu1 }
 0xccf   : > { %v4244_v57 = vadd.f32 %v3392_v53, %v1990_v56 }
 0xcd0   : > { %2077 = vrot.lane.b32.xlu0 %v4242_v55, %s4402_s0 }
 0xcd1   : > { %2000 = vrot.lane.b32.xlu1 %v4244_v57, %s4402_s0  ;;  %s4407_s0 = smov 16  }
 0xd42   : > { %v2078_v59 = vpop.permute.xlu0 %2077 }
 0xd43   : > { %v2001_v58 = vpop.permute.xlu1 %2000 }
 0xd44   : > { %3642 = vmatpush3.xpose.msk.msra.mxu1 %vm826_vm2, %v2001_v58 }
 0xd45   : > { %3646 = vmatprep.subr.mxu1 %v3888_v8 }
 0xd47   : > { %3644 = vmatmul.mubr.msk.f32.vlgmr.msra.gmra.mrb[16].mxu1 %vm826_vm2, %v4244_v57 }
 0xd48   : > { %3647 = vmatpush3.xpose.msk.msra.mxu1 %vm826_vm2, %v2078_v59  ;;  %3648 = vmatprep.mubr.msk.f32.mxu1 %vm3889_vm1, %v3888_v8 }
 0xd49   : > { %3656 = vmatprep.subr.mxu1 %v3888_v8 }
 0xd4b   : > { %3649 = vmatmul.mubr.msk.f32.vlgmr.msra.gmra.mrb[18].mxu1 %vm826_vm2, %v4242_v55 }
 0xd4c   : > { %3658 = vmatprep.mubr.msk.f32.mxu1 %vm3889_vm1, %v3888_v8 }
 0xe1a   : > { %v2072_v60 = vpop.f32.mrb[16].mxu1 }
 0xe1b   : > { %v2153_v61 = vmul.f32 0.25, %v2072_v60  ;;  %v3645_v62 = vpop.f32.mrb[17].mxu1 }
 0xe1d   : > { %v2155_v63 = vadd.f32 %v2153_v61, %v4057_v30 }
 0xe1e   : > { %v2149_v0 = vpop.f32.mrb[18].mxu1 }
 0xe1f   : > { %v2154_v1 = vmul.f32 0.25, %v2149_v0  ;;  %v3650_v2 = vpop.f32.mrb[19].mxu1  ;;  %v2157_v3 = vsel %vm994_vm3, %v2155_v63, -inf }
 0xe20   : > { %2158 = vmax.xlane.f32.xlu1 %v2157_v3  ;;  %v3408_v2 = vld [vmem:[%s4118_s28 + $0x28] sm:$0xff] }
 0xe21   : > { %v2156_v4 = vadd.f32 %v2154_v1, %v4061_v36  ;;  %v3407_v1 = vld [vmem:[%s4118_s28 + $0x20] sm:$0xff] }
 0xe22   : > { %v3770_v3 = vpack.c.bf16 %v3408_v2, %v3407_v1  ;;  %v3432_v1 = vld [vmem:[%s4178_s24 + $0x68] sm:$0xff] }
 0xe23   : > { %v2160_v5 = vsel %vm994_vm3, %v2156_v4, -inf }
 0xe24   : > { %2161 = vmax.xlane.f32.xlu0 %v2160_v5 }
 0xe31   : > { %2179 = vrot.lane.b32.xlu1 %v4244_v57, %s4403_s26 }
 0xe35   : > { %2333 = vrot.lane.b32.xlu1 %v4244_v57, %s4404_s27 }
 0xe39   : > { %2411 = vrot.lane.b32.xlu1 %v4242_v55, %s4404_s27 }
 0xe3a   : > { %2255 = vrot.lane.b32.xlu0 %v4242_v55, %s4403_s26 }
 0xead   : > { %v2159_v9 = vpop.xlane.xlu1 %2158 }
 0xeae   : > { %v2163_v10 = vsub.f32 %v2155_v63, %v2159_v9 }
 0xeb0   : > { %v2165_v6 = vmul.f32 1.442695, %v2163_v10 }
 0xeb1   : > { %v2180_v7 = vpop.permute.xlu1 %2179  ;;  %v2162_v11 = vpop.xlane.xlu0 %2161 }
 0xeb2   : > { %3847 = vpow2.f32 %v2165_v6  ;;  %v2164_v14 = vsub.f32 %v2156_v4, %v2162_v11  ;;  %3652 = vmatpush3.msra.mxu0 %v2180_v7  ;;  %v3410_v4 = vld [vmem:[%s4118_s28 + $0x38] sm:$0xff] }
 0xeb3   : > { %3661 = vmatprep.subr.mxu0 %v3888_v8 }
 0xeb4   : > { %v2167_v15 = vmul.f32 1.442695, %v2164_v14 }
 0xeb5   : > { %v2256_v16 = vpop.permute.xlu0 %2255  ;;  %v2334_v22 = vpop.permute.xlu1 %2333 }
 0xeb6   : > { %3849 = vpow2.f32 %v2167_v15  ;;  %3657 = vmatpush3.msra.mxu1 %v2256_v16 }
 0xeb7   : > { %3666 = vmatprep.subr.mxu1 %v3888_v8 }
 0xeb9   : > { %v2412_v23 = vpop.permute.xlu1 %2411 }
 0xebc   : > { %v3848_v17 = vpop.eup %3847 }
 0xebd   : > { %v2169_v18 = vsel %vm994_vm3, %v3848_v17, 0.0 }
 0xebe   : > { %2170 = vadd.xlane.f32.xlu1 %v2169_v18 }
 0xec0   : > { %v3850_v19 = vpop.eup %3849 }
 0xec1   : > { %v2172_v21 = vsel %vm994_vm3, %v3850_v19, 0.0 }
 0xec2   : > { %2173 = vadd.xlane.f32.xlu0 %v2172_v21 }
 0xecf   : > { %2409 = vrot.lane.b32.xlu1 %v4242_v55, %s4405_s15 }
 0xed8   : > { %2331 = vrot.lane.b32.xlu0 %v4244_v57, %s4405_s15 }
 0xf4b   : > { %v2171_v24 = vpop.xlane.xlu1 %2170 }
 0xf4c   : > { %3851 = vrcp.f32 %v2171_v24 }
 0xf4f   : > { %v2174_v25 = vpop.xlane.xlu0 %2173  ;;  %v2410_v33 = vpop.permute.xlu1 %2409 }
 0xf50   : > { %3853 = vrcp.f32 %v2174_v25 }
 0xf53   : > { %v2332_v32 = vpop.permute.xlu0 %2331 }
 0xf56   : > { %v3852_v26 = vpop.eup %3851 }
 0xf57   : > { %v2177_v27 = vmul.f32 %v3852_v26, %v3848_v17  ;;  %v3412_v17 = vld [vmem:[%s4136_s22 + $0x1] ss:$0 sm:$0xff] }
 0xf59   : > { %3654 = vmatmul.mubr.msk.f32.vlgmr.msra.gmra.mrb[10].mxu0 %vm994_vm3, %v2177_v27 }
 0xf5a   : > { %v3854_v29 = vpop.eup %3853  ;;  %3662 = vmatpush3.xpose.msk.msra.mxu0 %vm826_vm2, %v2334_v22  ;;  %3663 = vmatprep.mubr.msk.f32.mxu0 %vm3889_vm1, %v3888_v8 }
 0xf5b   : > { %v2178_v31 = vmul.f32 %v3854_v29, %v3850_v19  ;;  %3671 = vmatprep.subr.mxu0 %v3888_v8 }
 0xf5d   : > { %3659 = vmatmul.mubr.msk.f32.vlgmr.msra.gmra.mrb[20].mxu1 %vm994_vm3, %v2178_v31  ;;  %3664 = vmatmul.mubr.msk.f32.vlgmr.msra.gmra.mrb[12].mxu0 %vm826_vm2, %v2332_v32 }
 0xf5e   : > { %3667 = vmatpush3.xpose.msk.msra.mxu1 %vm826_vm2, %v2412_v23  ;;  %3668 = vmatprep.mubr.msk.f32.mxu1 %vm3889_vm1, %v3888_v8 }
 0xf5f   : > { %3676 = vmatprep.subr.mxu1 %v3888_v8  ;;  %3673 = vmatprep.mubr.msk.f32.mxu0 %vm3889_vm1, %v3888_v8 }
 0xf61   : > { %3669 = vmatmul.mubr.msk.f32.vlgmr.msra.gmra.mrb[22].mxu1 %vm826_vm2, %v2410_v33 }
 0xf62   : > { %3678 = vmatprep.mubr.msk.f32.mxu1 %vm3889_vm1, %v3888_v8 }
0x102c   : > { %v4298_v13 = vpop.f32.mrb[10].mxu0 }
0x102d   : > { %v3655_v34 = vpop.f32.mrb[11].mxu0 }
0x1030   : > { %v4300_v35 = vpop.f32.mrb[20].mxu1  ;;  %v2405_v37 = vpop.f32.mrb[12].mxu0 }
0x1031   : > { %v2487_v38 = vmul.f32 0.25, %v2405_v37  ;;  %v3660_v39 = vpop.f32.mrb[21].mxu1  ;;  %v3665_v40 = vpop.f32.mrb[13].mxu0  ;;  %v3419_v37 = vld [vmem:[%s4149_s16 + $0x20] sm:$0xff] }
0x1032   : > { %v3421_v40 = vld [vmem:[%s4149_s16 + $0x30] sm:$0xff] }
0x1033   : > { %v2489_v12 = vadd.f32 %v2487_v38, %v4057_v30  ;;  %v3420_v38 = vld [vmem:[%s4149_s16 + $0x28] sm:$0xff] }
0x1034   : > { %v2483_v41 = vpop.f32.mrb[22].mxu1  ;;  %v3778_v39 = vpack.c.bf16 %v3420_v38, %v3419_v37 }
0x1035   : > { %v2488_v42 = vmul.f32 0.25, %v2483_v41  ;;  %v3670_v43 = vpop.f32.mrb[23].mxu1  ;;  %v2491_v44 = vsel %vm994_vm3, %v2489_v12, -inf }
0x1036   : > { %2492 = vmax.xlane.f32.xlu0 %v2491_v44 }
0x1037   : > { %v2490_v45 = vadd.f32 %v2488_v42, %v4061_v36 }
0x1039   : > { %v2494_v8 = vsel %vm994_vm3, %v2490_v45, -inf }
0x103a   : > { %2495 = vmax.xlane.f32.xlu1 %v2494_v8 }
0x104b   : > { %2513 = vrot.lane.b32.xlu1 %v4244_v57, %s4406_s30 }
0x10c3   : > { %v2493_v46 = vpop.xlane.xlu0 %2492 }
0x10c4   : > { %v2497_v47 = vsub.f32 %v2489_v12, %v2493_v46  ;;  %v3422_v12 = vld [vmem:[%s4149_s16 + $0x38] sm:$0xff] }
0x10c5   : > { %v3782_v41 = vpack.c.bf16 %v3422_v12, %v3421_v40 }
0x10c6   : > { %v2499_v48 = vmul.f32 1.442695, %v2497_v47 }
0x10c7   : > { %v2496_v49 = vpop.xlane.xlu1 %2495 }
0x10c8   : > { %3855 = vpow2.f32 %v2499_v48  ;;  %v2498_v30 = vsub.f32 %v2490_v45, %v2496_v49  ;;  %v3417_v48 = vld [vmem:[%s4159_s25 + $0x1] ss:$0 sm:$0xff] }
0x10ca   : > { %v2501_v50 = vmul.f32 1.442695, %v2498_v30  ;;  %v3418_v30 = vld [vmem:[%s4165_s19 + $0x1] ss:$0 sm:$0xff]  ;;  %s698_s19 = scalar_lea.vmem %s4385_s14, %s4014_s23 }
0x10cb   : > { %v2514_v53 = vpop.permute.xlu1 %2513 }
0x10cc   : > { %3857 = vpow2.f32 %v2501_v50  ;;  %3672 = vmatpush3.msra.mxu0 %v2514_v53 }
0x10cd   : > { %3771 = vmatprep.subr.bf16.mxu0 %v3770_v3 }
0x10d2   : > { %v3856_v54 = vpop.eup %3855 }
0x10d3   : > { %v2503_v56 = vsel %vm994_vm3, %v3856_v54, 0.0 }
0x10d4   : > { %2504 = vadd.xlane.f32.xlu0 %v2503_v56 }
0x10d6   : > { %v3858_v36 = vpop.eup %3857 }
0x10d7   : > { %v2506_v58 = vsel %vm994_vm3, %v3858_v36, 0.0 }
0x10d8   : > { %2507 = vadd.xlane.f32.xlu0 %v2506_v58 }
0x10ee   : > { %2589 = vrot.lane.b32.xlu0 %v4242_v55, %s4406_s30  ;;  %v3409_v55 = vld [vmem:[%s4118_s28 + $0x30] sm:$0xff] }
0x10ef   : > { %v3774_v5 = vpack.c.bf16 %v3410_v4, %v3409_v55  ;;  %v3434_v55 = vld [vmem:[%s4178_s24 + $0x78] sm:$0xff] }
0x1161   : > { %v2505_v57 = vpop.xlane.xlu0 %2504 }
0x1162   : > { %3859 = vrcp.f32 %v2505_v57  ;;  %v3427_v57 = vld [vmem:[%s4178_s24 + $0x40] sm:$0xff] }
0x1165   : > { %v2508_v59 = vpop.xlane.xlu0 %2507 }
0x1166   : > { %3861 = vrcp.f32 %v2508_v59  ;;  %v3428_v59 = vld [vmem:[%s4178_s24 + $0x48] sm:$0xff] }
0x1169   : > { %v2590_v60 = vpop.permute.xlu0 %2589 }
0x116a   : > { %3677 = vmatpush3.msra.mxu1 %v2590_v60  ;;  %v3786_v60 = vpack.c.bf16 %v3428_v59, %v3427_v57 }
0x116b   : > { %3779 = vmatprep.subr.bf16.mxu1 %v3778_v39 }
0x116c   : > { %v3860_v61 = vpop.eup %3859 }
0x116d   : > { %v2511_v62 = vmul.f32 %v3860_v61, %v3856_v54  ;;  %v3429_v61 = vld [vmem:[%s4178_s24 + $0x50] sm:$0xff] }
0x116f   : > { %3674 = vmatmul.mubr.msk.f32.vlgmr.msra.gmra.mrb[14].mxu0 %vm994_vm3, %v2511_v62  ;;  %v3430_v62 = vld [vmem:[%s4178_s24 + $0x58] sm:$0xff] }
0x1170   : > { %v3862_v63 = vpop.eup %3861  ;;  %3773 = vmatpush3.bf16.msra.mxu0 %v3770_v3  ;;  %v3433_v3 = vld [vmem:[%s4178_s24 + $0x70] sm:$0xff] }
0x1171   : > { %v2512_v0 = vmul.f32 %v3862_v63, %v3858_v36  ;;  %3775 = vmatprep.subr.bf16.mxu0 %v3774_v5  ;;  %v3790_v63 = vpack.c.bf16 %v3430_v62, %v3429_v61  ;;  %v3798_v4 = vpack.c.bf16 %v3434_v55, %v3433_v3 }
0x1173   : > { %3679 = vmatmul.mubr.msk.f32.vlgmr.msra.gmra.mrb[24].mxu1 %vm994_vm3, %v2512_v0  ;;  %v3431_v0 = vld [vmem:[%s4178_s24 + $0x60] sm:$0xff] }
0x1174   : > { %3777 = vmatpush3.bf16.msra.mxu0 %v3774_v5  ;;  %3781 = vmatpush3.bf16.msra.mxu1 %v3778_v39  ;;  %v3794_v2 = vpack.c.bf16 %v3432_v1, %v3431_v0  ;;  %v3424_v5 = vld [vmem:[%s4193_s21 + $0x1] ss:$0 sm:$0xff] }
0x1175   : > { %3783 = vmatprep.subr.bf16.mxu1 %v3782_v41  ;;  %3787 = vmatprep.subr.bf16.mxu0 %v3786_v60 }
0x1178   : > { %3785 = vmatpush3.bf16.msra.mxu1 %v3782_v41 }
0x1242   : > { %v2585_v9 = vpop.f32.mrb[14].mxu0 }
0x1243   : > { %2667 = vrot.lane.b32.xlu1 %v2585_v9, %s4407_s0  ;;  %v3675_v10 = vpop.f32.mrb[15].mxu0 }
0x1246   : > { %v2661_v6 = vpop.f32.mrb[24].mxu1 }
0x1247   : > { %2669 = vrot.lane.b32.xlu1 %v2661_v6, %s4407_s0  ;;  %v3680_v7 = vpop.f32.mrb[25].mxu1 }
0x12b5   : > { %v2668_v11 = vpop.permute.xlu1 %2667 }
0x12b6   : > { %v2673_v14 = vsel %vm826_vm2, %v4298_v13, %v2668_v11 }
0x12b7   : > { %3689 = vmatprep.mubr.msk.f32.mxu0 %vm741_vm0, %v2673_v14 }
0x12b9   : > { %v2670_v15 = vpop.permute.xlu1 %2669 }
0x12ba   : > { %v2674_v16 = vsel %vm826_vm2, %v4300_v35, %v2670_v15 }
0x12bb   : > { %3690 = vmatmul.mubr.msk.f32.vlgmr.msra.gmra.mrb[16].mxu0 %vm741_vm0, %v2674_v16 }
0x12bc   : > { %3789 = vmatpush3.bf16.msra.mxu0 %v3786_v60 }
0x12bd   : > { %3791 = vmatprep.subr.bf16.mxu0 %v3790_v63 }
0x12c0   : > { %3793 = vmatpush3.bf16.msra.mxu0 %v3790_v63  ;;  %v3441_v63 = vld [vmem:[%s4221_s18 + $0x1] ss:$0 sm:$0xff] }
0x12c1   : > { %3795 = vmatprep.subr.bf16.mxu0 %v3794_v2 }
0x12c4   : > { %3797 = vmatpush3.bf16.msra.mxu0 %v3794_v2 }
0x12c5   : > { %3799 = vmatprep.subr.bf16.mxu0 %v3798_v4 }
0x12c8   : > { %3801 = vmatpush3.bf16.msra.mxu0 %v3798_v4 }
0x138e   : > { %v3691_v18 = vpop.f32.mrb[16].mxu0 }
0x138f   : > { %v2766_v19 = vadd.f32 %v3691_v18, %v3412_v17  ;;  %v2760_v21 = vpop.f32.mrb[17].mxu0 }
0x1390   : > { %v2761_v22 = vadd.f32 %v3412_v17, %v2760_v21 }
0x1391   : > { %v2770_v23 = vadd.f32 %v2766_v19, %v4233_v52 }
0x1392   : > { %v2769_v24 = vadd.f32 %v2761_v22, %v4231_v51 }
0x1393   : > { %v2778_v25 = vsel %vm741_vm0, %v2770_v23, 0.0 }
0x1394   : > { %2779 = vadd.xlane.f32.xlu1 %v2778_v25  ;;  %v2775_v26 = vsel %vm741_vm0, %v2769_v24, 0.0 }
0x1395   : > { %2776 = vadd.xlane.f32.xlu0 %v2775_v26 }
0x1421   : > { %v2780_v27 = vpop.xlane.xlu1 %2779 }
0x1422   : > { %v2782_v29 = vmul.f32 0.03125, %v2780_v27  ;;  %v2777_v31 = vpop.xlane.xlu0 %2776 }
0x1423   : > { %v2781_v32 = vmul.f32 0.03125, %v2777_v31 }
0x1424   : > { %v2784_v33 = vsub.f32 %v2770_v23, %v2782_v29 }
0x1425   : > { %v2783_v13 = vsub.f32 %v2769_v24, %v2781_v32 }
0x1426   : > { %v2786_v51 = vmul.f32 %v2784_v33, %v2784_v33 }
0x1427   : > { %v2785_v34 = vmul.f32 %v2783_v13, %v2783_v13 }
0x1428   : > { %v2790_v35 = vsel %vm741_vm0, %v2786_v51, 0.0 }
0x1429   : > { %v2787_v52 = vsel %vm741_vm0, %v2785_v34, 0.0 }
0x142a   : > { %2788 = vadd.xlane.f32.xlu0 %v2787_v52 }
0x142e   : > { %2791 = vadd.xlane.f32.xlu0 %v2790_v35 }
0x14b7   : > { %v2789_v42 = vpop.xlane.xlu0 %2788 }
0x14b8   : > { %v2793_v43 = vmul.f32 0.03125, %v2789_v42 }
0x14ba   : > { %v2795_v44 = vadd.f32 1e-12, %v2793_v43 }
0x14bb   : > { %v2792_v45 = vpop.xlane.xlu0 %2791 }
0x14bc   : > { %3863 = vrsqrt.f32 %v2795_v44  ;;  %v2794_v8 = vmul.f32 0.03125, %v2792_v45 }
0x14be   : > { %v2796_v46 = vadd.f32 1e-12, %v2794_v8 }
0x14c0   : > { %3865 = vrsqrt.f32 %v2796_v46 }
0x14c6   : > { %v3864_v47 = vpop.eup %3863 }
0x14c7   : > { %v2799_v49 = vmul.f32 %v3864_v47, %v2783_v13  ;;  %v3436_v13 = vld [vmem:[%s4204_s20 + $0x1] ss:$0 sm:$0xff] }
0x14c9   : > { %v2807_v50 = vmul.f32 %v3417_v48, %v2799_v49  ;;  %v3879_v49 = vld [vmem:[%s4047_s17] sm:$0x3] }
0x14ca   : > { %v3866_v53 = vpop.eup %3865 }
0x14cb   : > { %v2800_v54 = vmul.f32 %v3866_v53, %v2784_v33  ;;  %v2815_v56 = vadd.f32 %v3418_v30, %v2807_v50  ;;  %v3084_v50 = vsub.s32 1, %v4049_v20  ;;  %v3078_v53 = vrot.slane %v3879_v49, %v4054_v28  ;;  %v3442_v20 = vld [vmem:[%s4227_s1 + $0x1] ss:$0 sm:$0xff] }
0x14cd   : > { %v2808_v36 = vmul.f32 %v3417_v48, %v2800_v54  ;;  %3700 = vmatprep.mubr.msk.f32.mxu1 %vm741_vm0, %v2815_v56  ;;  %v3085_v54 = vrot.slane %v3879_v49, %v3084_v50 }
0x14cf   : > { %v2816_v58 = vadd.f32 %v3418_v30, %v2808_v36  ;;  %v3106_v30 = vsel %vm3105_vm5, %v3879_v49, 0.0 }
0x14d1   : > { %3701 = vmatmul.mubr.msk.f32.vlgmr.msra.gmra.mrb[26].mxu1 %vm741_vm0, %v2816_v58 }
0x15a4   : > { %v3702_v9 = vpop.f32.mrb[26].mxu1 }
0x15a5   : > { %v2908_v10 = vadd.f32 %v3702_v9, %v3424_v5  ;;  %v2902_v6 = vpop.f32.mrb[27].mxu1 }
0x15a6   : > { %v2903_v7 = vadd.f32 %v3424_v5, %v2902_v6 }
0x15a7   : > { %v2912_v11 = vmul.f32 %v2908_v10, %v2908_v10 }
0x15a8   : > { %v2911_v14 = vmul.f32 %v2903_v7, %v2903_v7 }
0x15a9   : > { %v2914_v15 = vmul.f32 %v2912_v11, %v2908_v10 }
0x15aa   : > { %v2913_v16 = vmul.f32 %v2911_v14, %v2903_v7 }
0x15ab   : > { %v2916_v17 = vmul.f32 0.044715, %v2914_v15 }
0x15ac   : > { %v2915_v18 = vmul.f32 0.044715, %v2913_v16 }
0x15ad   : > { %v2918_v19 = vadd.f32 %v2916_v17, %v2908_v10 }
0x15ae   : > { %v2917_v21 = vadd.f32 %v2915_v18, %v2903_v7 }
0x15af   : > { %v2920_v22 = vmul.f32 0.7978846, %v2918_v19 }
0x15b0   : > { %v2919_v23 = vmul.f32 0.7978846, %v2917_v21 }
0x15b1   : > { %3867 = vtanh.f32 %v2920_v22 }
0x15b2   : > { %3869 = vtanh.f32 %v2919_v23 }
0x15bb   : > { %v3868_v24 = vpop.eup %3867 }
0x15bc   : > { %v3870_v25 = vpop.eup %3869  ;;  %v2924_v26 = vadd.f32 1.0, %v3868_v24 }
0x15bd   : > { %v2923_v27 = vadd.f32 1.0, %v3870_v25 }
0x15be   : > { %v2926_v29 = vmul.f32 0.5, %v2924_v26 }
0x15bf   : > { %v2925_v31 = vmul.f32 0.5, %v2923_v27 }
0x15c0   : > { %v2928_v33 = vmul.f32 %v2926_v29, %v2908_v10 }
0x15c1   : > { %v2927_v32 = vmul.f32 %v2925_v31, %v2903_v7 }
0x15c3   : > { %3719 = vmatprep.mubr.msk.f32.mxu0 %vm1777_vm4, %v2927_v32 }
0x15c4   : > { %3720 = vmatmul.mubr.msk.f32.vlgmr.msra.gmra.mrb[18].mxu0 %vm1777_vm4, %v2928_v33 }
0x1697   : > { %v3721_v34 = vpop.f32.mrb[18].mxu0 }
0x1698   : > { %v3024_v52 = vadd.f32 %v3721_v34, %v3436_v13  ;;  %v3018_v51 = vpop.f32.mrb[19].mxu0 }
0x1699   : > { %v3019_v35 = vadd.f32 %v3436_v13, %v3018_v51 }
0x169a   : > { %v3028_v37 = vadd.f32 %v3024_v52, %v2816_v58 }
0x169b   : > { %v3027_v38 = vadd.f32 %v3019_v35, %v2815_v56 }
0x169c   : > { %v3036_v39 = vsel %vm741_vm0, %v3028_v37, 0.0 }
0x169d   : > { %3037 = vadd.xlane.f32.xlu1 %v3036_v39  ;;  %v3033_v40 = vsel %vm741_vm0, %v3027_v38, 0.0 }
0x169e   : > { %3034 = vadd.xlane.f32.xlu0 %v3033_v40 }
0x172a   : > { %v3038_v12 = vpop.xlane.xlu1 %3037 }
0x172b   : > { %v3040_v41 = vmul.f32 0.03125, %v3038_v12  ;;  %v3035_v42 = vpop.xlane.xlu0 %3034 }
0x172c   : > { %v3039_v43 = vmul.f32 0.03125, %v3035_v42 }
0x172d   : > { %v3042_v44 = vsub.f32 %v3028_v37, %v3040_v41 }
0x172e   : > { %v3041_v45 = vsub.f32 %v3027_v38, %v3039_v43 }
0x172f   : > { %v3044_v8 = vmul.f32 %v3042_v44, %v3042_v44 }
0x1730   : > { %v3043_v46 = vmul.f32 %v3041_v45, %v3041_v45 }
0x1731   : > { %v3048_v47 = vsel %vm741_vm0, %v3044_v8, 0.0 }
0x1732   : > { %3049 = vadd.xlane.f32.xlu1 %v3048_v47  ;;  %v3045_v48 = vsel %vm741_vm0, %v3043_v46, 0.0 }
0x1733   : > { %3046 = vadd.xlane.f32.xlu0 %v3045_v48 }
0x1736   : > { %3107 = vadd.xlane.f32.xlu1 %v3106_v30 }
0x1747   : > { %3080 = vbcast.lane.b32.xlu1 %v3078_v53, 256 }
0x1749   : > { %3087 = vbcast.lane.b32.xlu0 %v3085_v54, 256 }
0x17bf   : > { %v3050_v56 = vpop.xlane.xlu1 %3049 }
0x17c0   : > { %v3052_v36 = vmul.f32 0.03125, %v3050_v56  ;;  %v3047_v58 = vpop.xlane.xlu0 %3046 }
0x17c1   : > { %v3051_v57 = vmul.f32 0.03125, %v3047_v58 }
0x17c2   : > { %v3054_v59 = vadd.f32 1e-12, %v3052_v36 }
0x17c3   : > { %v3053_v60 = vadd.f32 1e-12, %v3051_v57  ;;  %v3108_v61 = vpop.xlane.xlu1 %3107 }
0x17c4   : > { %3871 = vrsqrt.f32 %v3054_v59  ;;  %v3088_v3 = vpop.permute.xlu0 %3087  ;;  %v3110_v10 = vrot.slane %v3108_v61, 1 }
0x17c5   : > { %3873 = vrsqrt.f32 %v3053_v60 }
0x17c6   : > { %3875 = vrcp.f32 %v3110_v10 }
0x17c7   : > { %v3081_v5 = vpop.permute.xlu1 %3080  ;;  %3877 = vrcp.f32 %v3108_v61 }
0x17ce   : > { %v3872_v62 = vpop.eup %3871 }
0x17cf   : > { %v3874_v0 = vpop.eup %3873  ;;  %v3058_v1 = vmul.f32 %v3872_v62, %v3042_v44 }
0x17d0   : > { %v3057_v2 = vmul.f32 %v3874_v0, %v3041_v45  ;;  %v3876_v27 = vpop.eup %3875 }
0x17d1   : > { %v3066_v28 = vmul.f32 %v3441_v63, %v3058_v1  ;;  %v3878_v31 = vpop.eup %3877 }
0x17d2   : > { %v3065_v55 = vmul.f32 %v3441_v63, %v3057_v2 }
0x17d3   : > { %v3074_v4 = vadd.f32 %v3442_v20, %v3066_v28 }
0x17d4   : > { %v3073_v9 = vadd.f32 %v3442_v20, %v3065_v55 }
0x17d5   : > { %v3090_v6 = vmul.f32 %v3088_v3, %v3074_v4 }
0x17d6   : > { %v3089_v7 = vmul.f32 %v3081_v5, %v3073_v9 }
0x17d7   : > { %v3098_v11 = vsel %vm741_vm0, %v3090_v6, 0.0 }
0x17d8   : > { %v3099_v14 = vrot.slane %v3098_v11, 4  ;;  %v3091_v15 = vsel %vm741_vm0, %v3089_v7, 0.0 }
0x17d9   : > { %v3092_v16 = vrot.slane %v3091_v15, 4 }
0x17da   : > { %v3100_v17 = vadd.f32 %v3099_v14, %v3098_v11 }
0x17db   : > { %v3093_v18 = vadd.f32 %v3092_v16, %v3091_v15 }
0x17dc   : > { %v3101_v19 = vrot.slane %v3100_v17, 2 }
0x17dd   : > { %v3094_v21 = vrot.slane %v3093_v18, 2 }
0x17de   : > { %v3102_v22 = vadd.f32 %v3101_v19, %v3100_v17 }
0x17df   : > { %v3095_v23 = vadd.f32 %v3094_v21, %v3093_v18 }
0x17e0   : > { %v3103_v24 = vrot.slane %v3102_v22, 1 }
0x17e1   : > { %v3096_v25 = vrot.slane %v3095_v23, 1 }
0x17e2   : > { %v3104_v26 = vadd.f32 %v3103_v24, %v3102_v22 }
0x17e3   : > { %v3097_v29 = vadd.f32 %v3096_v25, %v3095_v23 }
0x17e4   : > { %v3116_v32 = vmul.f32 %v3876_v27, %v3104_v26 }
0x17e5   : > { %v3114_v33 = vmul.f32 %v3878_v31, %v3097_v29 }
0x17e6   : > { %v3119_v13 = vrot.slane %v3116_v32, 7 }
0x17e8   : > { %v3121_v34 = vsel %vm3120_vm6, %v3119_v13, %v3114_v33 }
0x17e9   : > { %3124 = vst.msk [vmem:[%s698_s19] sm:$0x3] %vm3123_vm7, %v3121_v34 }
0x17ea PF: > { %s24_s29 = sadd.s32 1, %s3886_s29  }
0x17eb   : > { %p21_p4 = scmp.ge.s32.totalorder %s24_s29, 4  }
0x17ed   :  { %23 = sbr.rel (!%p21_p4) target bundleno = 3 (0x3), region = 157 }

</bundles_post_ra>
